<compile_context>
chip_gen: v7x
topology: tpu7x:2x2x1
jax: 0.10.0
libtpu: 0.0.40
codegen_flags: <defaults>
</compile_context>

<pallas_src>
import functools
import math

import jax
import jax.numpy as jnp
import numpy as np
from jax.experimental import pallas as pl
from jax.experimental.pallas import tpu as pltpu


# ----------------------------- in-kernel helpers -----------------------------

def _layernorm(v, eps=1e-5):
    # nn.LayerNorm(elementwise_affine=False): biased variance, eps=1e-5.
    mu = jnp.mean(v, axis=-1, keepdims=True)
    var = jnp.mean(jnp.square(v - mu), axis=-1, keepdims=True)
    return (v - mu) * jax.lax.rsqrt(var + eps)


def _gelu_tanh(z):
    # TODO(synk): PyTorch nn.GELU() default is exact erf; tanh approximation
    # differs by <= ~3e-3 abs (inside test tolerance) and keeps the heavy
    # elementwise work on the EUP slot instead of a VALU erf polynomial.
    c = math.sqrt(2.0 / math.pi)
    return 0.5 * z * (1.0 + jnp.tanh(c * (z + 0.044715 * z * z * z)))


# --------------------------------- kernel ------------------------------------

def dit_block_kernel(x_ref, mod_ref,
                     wqkv_ref, bqkv_ref, wout_ref, bout_ref,
                     w1_ref, b1_ref, w2_ref, b2_ref,
                     out_ref, o_acc, *, num_heads):
    x = x_ref[0]                                   # (L, D) f32
    L, D = x.shape
    H = num_heads
    hd = D // H

    mod = mod_ref[0]                               # (6, D) f32; scale rows already +1
    shift_msa = mod[0:1, :]
    scale_msa = mod[1:2, :]
    gate_msa = mod[2:3, :]
    shift_mlp = mod[3:4, :]
    scale_mlp = mod[4:5, :]
    gate_mlp = mod[5:6, :]

    # --- attention branch ----------------------------------------------------
    h = _layernorm(x) * scale_msa + shift_msa                        # (L, D) f32
    # Single full-width QKV projection: (L, D) @ (D, 3D); q columns of the
    # weight/bias are pre-scaled by 1/sqrt(hd) in the wrapper.
    qkv = jnp.dot(h.astype(jnp.bfloat16), wqkv_ref[...],
                  preferred_element_type=jnp.float32) + bqkv_ref[...]  # (L, 3D)

    # Per-head attention core.  Static loop over heads; each head writes its
    # (L, hd) output into the (L, D) scratch so the output projection is one
    # full-width matmul.
    # TODO(synk): at production shapes move the head axis to the grid and
    # flash-tile over KV; also pad hd to 128 (or keep q/k/v head-major) to
    # avoid sub-128 lane slices.
    for hh in range(H):
        q_h = qkv[:, hh * hd:(hh + 1) * hd].astype(jnp.bfloat16)           # (L, hd)
        k_h = qkv[:, D + hh * hd:D + (hh + 1) * hd].astype(jnp.bfloat16)   # (L, hd)
        v_h = qkv[:, 2 * D + hh * hd:2 * D + (hh + 1) * hd].astype(jnp.bfloat16)

        s = jax.lax.dot_general(q_h, k_h, (((1,), (1,)), ((), ())),
                                preferred_element_type=jnp.float32)   # (L, L) f32
        s = s - jnp.max(s, axis=-1, keepdims=True)
        p = jnp.exp(s)
        p = p * pl.reciprocal(jnp.sum(p, axis=-1, keepdims=True), approx=True)

        o_acc[:, hh * hd:(hh + 1) * hd] = jnp.dot(
            p.astype(jnp.bfloat16), v_h, preferred_element_type=jnp.float32)

    # Single full-width output projection: (L, D) @ (D, D).
    attn = jnp.dot(o_acc[...].astype(jnp.bfloat16), wout_ref[...],
                   preferred_element_type=jnp.float32) + bout_ref[...]   # (L, D)
    x1 = x + gate_msa * attn

    # --- MLP branch -----------------------------------------------------------
    # TODO(synk): slab-tile the 4*D hidden dim for production sizes on v7x.
    h2 = _layernorm(x1) * scale_mlp + shift_mlp
    m = jnp.dot(h2.astype(jnp.bfloat16), w1_ref[...],
                preferred_element_type=jnp.float32) + b1_ref[...]        # (L, 4D)
    m = _gelu_tanh(m)
    m = jnp.dot(m.astype(jnp.bfloat16), w2_ref[...],
                preferred_element_type=jnp.float32) + b2_ref[...]        # (L, D)

    out_ref[0] = (x1 + gate_mlp * m).astype(out_ref.dtype)


# --------------------------------- wrapper ------------------------------------

def dit_block(x, c, params, num_heads):
    B, L, D = x.shape
    H = num_heads
    hd = D // H
    wmod, bmod, win, bin_, wout, bout, w1, b1, w2, b2 = params

    # adaLN conditioning hoisted out of the kernel (tiny M=B matmul); fold the
    # "+1" of modulate() into the scale rows and pass as (B, 6, D).
    mod = (jax.nn.silu(c) @ wmod + bmod).reshape(B, 6, D)
    plus1 = jnp.zeros((6, D), jnp.float32).at[1].set(1.0).at[4].set(1.0)
    mod = (mod + plus1).astype(jnp.float32)

    # Fold the attention 1/sqrt(hd) scale into the q columns of in_proj
    # (weight and bias), so the kernel does no extra (L, D) multiply.
    scale = 1.0 / math.sqrt(hd)
    col_scale = jnp.concatenate(
        [jnp.full((D,), scale, jnp.float32), jnp.ones((2 * D,), jnp.float32)])
    wqkv = (win * col_scale[None, :]).astype(jnp.bfloat16)    # (D, 3D)
    bqkv = (bin_ * col_scale[None, :]).astype(jnp.float32)    # (1, 3D)

    wout_b = wout.astype(jnp.bfloat16)                        # (D, D)
    w1_b = w1.astype(jnp.bfloat16)                            # (D, 4D)
    w2_b = w2.astype(jnp.bfloat16)                            # (4D, D)
    bout_f = bout.astype(jnp.float32)
    b1_f = b1.astype(jnp.float32)
    b2_f = b2.astype(jnp.float32)

    # Generation-aware VMEM limit (leave headroom below physical capacity).
    try:
        vmem_cap = int(pltpu.get_tpu_info().vmem_capacity_bytes)
    except Exception:
        vmem_cap = 64 * 1024 * 1024
    vmem_limit = int(max(vmem_cap - (16 << 20), (3 * vmem_cap) // 4))

    kernel = functools.partial(dit_block_kernel, num_heads=H)
    operands = (x, mod, wqkv, bqkv, wout_b, bout_f, w1_b, b1_f, w2_b, b2_f)

    def build(single_buffer_weights):
        def const_spec(shape):
            n = len(shape)
            idx = lambda b, _n=n: (0,) * _n
            if single_buffer_weights:
                # Grid-invariant block: one VMEM buffer is enough; halves the
                # resident weight footprint vs default double-buffering.
                return pl.BlockSpec(shape, idx, pipeline_mode=pl.Buffered(1))
            return pl.BlockSpec(shape, idx)

        return pl.pallas_call(
            kernel,
            out_shape=jax.ShapeDtypeStruct((B, L, D), x.dtype),
            grid_spec=pltpu.PrefetchScalarGridSpec(
                num_scalar_prefetch=0,
                grid=(B,),
                in_specs=[
                    pl.BlockSpec((1, L, D), lambda b: (b, 0, 0)),      # x slab
                    pl.BlockSpec((1, 6, D), lambda b: (b, 0, 0)),      # modulation
                    const_spec(wqkv.shape), const_spec(bqkv.shape),
                    const_spec(wout_b.shape), const_spec(bout_f.shape),
                    const_spec(w1_b.shape), const_spec(b1_f.shape),
                    const_spec(w2_b.shape), const_spec(b2_f.shape),
                ],
                out_specs=pl.BlockSpec((1, L, D), lambda b: (b, 0, 0)),
                scratch_shapes=[pltpu.VMEM((L, D), jnp.float32)],      # per-head out
            ),
            compiler_params=pltpu.CompilerParams(
                dimension_semantics=("parallel",),
                vmem_limit_bytes=vmem_limit),
        )

    try:
        return build(True)(*operands)
    except Exception:
        # TODO(synk): fallback for jax versions where BlockSpec.pipeline_mode /
        # Buffered(1) is not accepted by the TPU pallas_call pipeline.
        return build(False)(*operands)


# ------------------------------ pure-JAX reference ----------------------------

def dit_block_ref(x, c, params, num_heads):
    wmod, bmod, win, bin_, wout, bout, w1, b1, w2, b2 = params
    B, L, D = x.shape
    hd = D // num_heads

    def ln(v):
        mu = v.mean(-1, keepdims=True)
        var = jnp.square(v - mu).mean(-1, keepdims=True)
        return (v - mu) / jnp.sqrt(var + 1e-5)

    cc = jax.nn.silu(c)
    mod = cc @ wmod + bmod[0]
    shift_msa, scale_msa, gate_msa, shift_mlp, scale_mlp, gate_mlp = jnp.split(mod, 6, axis=1)

    h = ln(x) * (1 + scale_msa[:, None, :]) + shift_msa[:, None, :]
    qkv = h @ win + bin_[0]
    q, k, v = jnp.split(qkv, 3, axis=-1)
    q = q.reshape(B, L, num_heads, hd).transpose(0, 2, 1, 3)
    k = k.reshape(B, L, num_heads, hd).transpose(0, 2, 1, 3)
    v = v.reshape(B, L, num_heads, hd).transpose(0, 2, 1, 3)
    s = (q @ k.transpose(0, 1, 3, 2)) / math.sqrt(hd)
    p = jax.nn.softmax(s, axis=-1)
    o = (p @ v).transpose(0, 2, 1, 3).reshape(B, L, D)
    attn = o @ wout + bout[0]
    x1 = x + gate_msa[:, None, :] * attn

    h2 = ln(x1) * (1 + scale_mlp[:, None, :]) + shift_mlp[:, None, :]
    m = jax.nn.gelu(h2 @ w1 + b1[0], approximate=False)
    m = m @ w2 + b2[0]
    return x1 + gate_mlp[:, None, :] * m


# ----------------------------------- main -------------------------------------

if __name__ == "__main__":
    B, L, D, H = 2, 8, 32, 4   # batch, seq, hidden, heads

    key = jax.random.PRNGKey(0)
    ks = jax.random.split(key, 12)

    def w(k, shape, fan_in):
        return jax.random.normal(k, shape, jnp.float32) / math.sqrt(fan_in)

    x = jax.random.normal(ks[0], (B, L, D), jnp.float32)
    c = jax.random.normal(ks[1], (B, D), jnp.float32)

    params = (
        w(ks[2], (D, 6 * D), D),             # adaLN linear weight  (in, out)
        w(ks[3], (1, 6 * D), D),             # adaLN linear bias
        w(ks[4], (D, 3 * D), D),             # attention in_proj weight
        w(ks[5], (1, 3 * D), D),             # attention in_proj bias
        w(ks[6], (D, D), D),                 # attention out_proj weight
        w(ks[7], (1, D), D),                 # attention out_proj bias
        w(ks[8], (D, 4 * D), D),             # MLP fc1 weight
        w(ks[9], (1, 4 * D), D),             # MLP fc1 bias
        w(ks[10], (4 * D, D), 4 * D),        # MLP fc2 weight
        w(ks[11], (1, D), 4 * D),            # MLP fc2 bias
    )

    out = dit_block(x, c, params, H)
    out = jax.block_until_ready(out)

    ref = jax.block_until_ready(dit_block_ref(x, c, params, H))
    np.testing.assert_allclose(np.asarray(out), np.asarray(ref),
                               rtol=2e-2, atol=2e-2)

    print("KERNEL_OK")
</pallas_src>

<mosaic_0001>
module attributes {stable_mosaic.version = 11 : i64} {
  func.func @dit_block_kernel(%arg0: i32, %arg1: memref<1x8x32xf32, #tpu.memory_space<vmem>>, %arg2: memref<1x6x32xf32, #tpu.memory_space<vmem>>, %arg3: memref<32x96xbf16, #tpu.memory_space<vmem>>, %arg4: memref<1x96xf32, #tpu.memory_space<vmem>>, %arg5: memref<32x32xbf16, #tpu.memory_space<vmem>>, %arg6: memref<1x32xf32, #tpu.memory_space<vmem>>, %arg7: memref<32x128xbf16, #tpu.memory_space<vmem>>, %arg8: memref<1x128xf32, #tpu.memory_space<vmem>>, %arg9: memref<128x32xbf16, #tpu.memory_space<vmem>>, %arg10: memref<1x32xf32, #tpu.memory_space<vmem>>, %arg11: memref<1x8x32xf32, #tpu.memory_space<vmem>>, %arg12: memref<8x32xf32, #tpu.memory_space<vmem>>) attributes {dimension_semantics = [#tpu.dimension_semantics<parallel>], iteration_bounds = array<i64: 2>, scalar_prefetch = 0 : i64, scratch_operands = 1 : i64, tpu.core_type = #tpu.core_type<tc>, window_params = [{transform_indices = @transform_0, window_bounds = array<i64: 1, 8, 32>}, {transform_indices = @transform_1, window_bounds = array<i64: 1, 6, 32>}, {pipeline_mode = #tpu.pipeline_mode<synchronous>, transform_indices = @transform_2, window_bounds = array<i64: 32, 96>}, {pipeline_mode = #tpu.pipeline_mode<synchronous>, transform_indices = @transform_3, window_bounds = array<i64: 1, 96>}, {pipeline_mode = #tpu.pipeline_mode<synchronous>, transform_indices = @transform_4, window_bounds = array<i64: 32, 32>}, {pipeline_mode = #tpu.pipeline_mode<synchronous>, transform_indices = @transform_5, window_bounds = array<i64: 1, 32>}, {pipeline_mode = #tpu.pipeline_mode<synchronous>, transform_indices = @transform_6, window_bounds = array<i64: 32, 128>}, {pipeline_mode = #tpu.pipeline_mode<synchronous>, transform_indices = @transform_7, window_bounds = array<i64: 1, 128>}, {pipeline_mode = #tpu.pipeline_mode<synchronous>, transform_indices = @transform_8, window_bounds = array<i64: 128, 32>}, {pipeline_mode = #tpu.pipeline_mode<synchronous>, transform_indices = @transform_9, window_bounds = array<i64: 1, 32>}, {transform_indices = @transform_10, window_bounds = array<i64: 1, 8, 32>}]} {
    %c0 = arith.constant 0 : index
    %c0_0 = arith.constant 0 : index
    %c0_1 = arith.constant 0 : index
    %0 = vector.load %arg1[%c0, %c0_0, %c0_1] : memref<1x8x32xf32, #tpu.memory_space<vmem>>, vector<1x8x32xf32>
    %1 = vector.shape_cast %0 : vector<1x8x32xf32> to vector<8x32xf32>
    %c0_2 = arith.constant 0 : index
    %c0_3 = arith.constant 0 : index
    %c0_4 = arith.constant 0 : index
    %2 = vector.load %arg2[%c0_2, %c0_3, %c0_4] : memref<1x6x32xf32, #tpu.memory_space<vmem>>, vector<1x6x32xf32>
    %3 = vector.shape_cast %2 : vector<1x6x32xf32> to vector<6x32xf32>
    %4 = vector.extract_strided_slice %3 {offsets = [0, 0], sizes = [1, 32], strides = [1, 1]} : vector<6x32xf32> to vector<1x32xf32>
    %5 = vector.extract_strided_slice %3 {offsets = [1, 0], sizes = [1, 32], strides = [1, 1]} : vector<6x32xf32> to vector<1x32xf32>
    %6 = vector.extract_strided_slice %3 {offsets = [2, 0], sizes = [1, 32], strides = [1, 1]} : vector<6x32xf32> to vector<1x32xf32>
    %7 = vector.extract_strided_slice %3 {offsets = [3, 0], sizes = [1, 32], strides = [1, 1]} : vector<6x32xf32> to vector<1x32xf32>
    %8 = vector.extract_strided_slice %3 {offsets = [4, 0], sizes = [1, 32], strides = [1, 1]} : vector<6x32xf32> to vector<1x32xf32>
    %9 = vector.extract_strided_slice %3 {offsets = [5, 0], sizes = [1, 32], strides = [1, 1]} : vector<6x32xf32> to vector<1x32xf32>
    %cst = arith.constant dense<0.000000e+00> : vector<8xf32>
    %10 = vector.multi_reduction <add>, %1, %cst [1] : vector<8x32xf32> to vector<8xf32>
    %11 = vector.shape_cast %10 : vector<8xf32> to vector<8x1xf32>
    %cst_5 = arith.constant 3.200000e+01 : f32
    %12 = vector.broadcast %cst_5 : f32 to vector<8x1xf32>
    %13 = arith.divf %11, %12 : vector<8x1xf32>
    %14 = vector.broadcast %13 : vector<8x1xf32> to vector<8x32xf32>
    %15 = arith.subf %1, %14 : vector<8x32xf32>
    %16 = arith.mulf %15, %15 : vector<8x32xf32>
    %cst_6 = arith.constant dense<0.000000e+00> : vector<8xf32>
    %17 = vector.multi_reduction <add>, %16, %cst_6 [1] : vector<8x32xf32> to vector<8xf32>
    %18 = vector.shape_cast %17 : vector<8xf32> to vector<8x1xf32>
    %cst_7 = arith.constant 3.200000e+01 : f32
    %19 = vector.broadcast %cst_7 : f32 to vector<8x1xf32>
    %20 = arith.divf %18, %19 : vector<8x1xf32>
    %21 = vector.broadcast %13 : vector<8x1xf32> to vector<8x32xf32>
    %22 = arith.subf %1, %21 : vector<8x32xf32>
    %cst_8 = arith.constant 9.99999974E-6 : f32
    %23 = vector.broadcast %cst_8 : f32 to vector<8x1xf32>
    %24 = arith.addf %20, %23 : vector<8x1xf32>
    %25 = math.rsqrt %24 : vector<8x1xf32>
    %26 = vector.broadcast %25 : vector<8x1xf32> to vector<8x32xf32>
    %27 = arith.mulf %22, %26 : vector<8x32xf32>
    %28 = vector.broadcast %5 : vector<1x32xf32> to vector<8x32xf32>
    %29 = arith.mulf %27, %28 : vector<8x32xf32>
    %30 = vector.broadcast %4 : vector<1x32xf32> to vector<8x32xf32>
    %31 = arith.addf %29, %30 : vector<8x32xf32>
    %32 = arith.truncf %31 : vector<8x32xf32> to vector<8x32xbf16>
    %c0_9 = arith.constant 0 : index
    %c0_10 = arith.constant 0 : index
    %33 = vector.load %arg3[%c0_9, %c0_10] : memref<32x96xbf16, #tpu.memory_space<vmem>>, vector<32x96xbf16>
    %cst_11 = arith.constant dense<0.000000e+00> : vector<8x96xf32>
    %34 = tpu.matmul %32, %33, %cst_11 {dimension_numbers = #tpu.dot_dimension_numbers<[1], [0], [0], [1], [0, 0, 1, 1], [], []>} : vector<8x32xbf16>, vector<32x96xbf16>, vector<8x96xf32> -> vector<8x96xf32>
    %c0_12 = arith.constant 0 : index
    %c0_13 = arith.constant 0 : index
    %35 = vector.load %arg4[%c0_12, %c0_13] : memref<1x96xf32, #tpu.memory_space<vmem>>, vector<1x96xf32>
    %36 = vector.broadcast %35 : vector<1x96xf32> to vector<8x96xf32>
    %37 = arith.addf %34, %36 : vector<8x96xf32>
    %38 = vector.extract_strided_slice %37 {offsets = [0, 0], sizes = [8, 8], strides = [1, 1]} : vector<8x96xf32> to vector<8x8xf32>
    %39 = arith.truncf %38 : vector<8x8xf32> to vector<8x8xbf16>
    %40 = vector.extract_strided_slice %37 {offsets = [0, 32], sizes = [8, 8], strides = [1, 1]} : vector<8x96xf32> to vector<8x8xf32>
    %41 = arith.truncf %40 : vector<8x8xf32> to vector<8x8xbf16>
    %42 = vector.extract_strided_slice %37 {offsets = [0, 64], sizes = [8, 8], strides = [1, 1]} : vector<8x96xf32> to vector<8x8xf32>
    %43 = arith.truncf %42 : vector<8x8xf32> to vector<8x8xbf16>
    %cst_14 = arith.constant dense<0.000000e+00> : vector<8x8xf32>
    %44 = tpu.matmul %39, %41, %cst_14 {dimension_numbers = #tpu.dot_dimension_numbers<[1], [1], [0], [0], [0, 0, 1, 0], [], []>} : vector<8x8xbf16>, vector<8x8xbf16>, vector<8x8xf32> -> vector<8x8xf32>
    %cst_15 = arith.constant dense<0xFF800000> : vector<8xf32>
    %45 = vector.multi_reduction <maximumf>, %44, %cst_15 [1] : vector<8x8xf32> to vector<8xf32>
    %46 = vector.shape_cast %45 : vector<8xf32> to vector<8x1xf32>
    %47 = vector.broadcast %46 : vector<8x1xf32> to vector<8x8xf32>
    %48 = arith.subf %44, %47 : vector<8x8xf32>
    %49 = math.exp %48 : vector<8x8xf32>
    %cst_16 = arith.constant dense<0.000000e+00> : vector<8xf32>
    %50 = vector.multi_reduction <add>, %49, %cst_16 [1] : vector<8x8xf32> to vector<8xf32>
    %51 = vector.shape_cast %50 : vector<8xf32> to vector<8x1xf32>
    %52 = tpu.reciprocal %51 {approx = true} : vector<8x1xf32> -> vector<8x1xf32>
    %53 = vector.broadcast %52 : vector<8x1xf32> to vector<8x8xf32>
    %54 = arith.mulf %49, %53 : vector<8x8xf32>
    %55 = arith.truncf %54 : vector<8x8xf32> to vector<8x8xbf16>
    %cst_17 = arith.constant dense<0.000000e+00> : vector<8x8xf32>
    %56 = tpu.matmul %55, %43, %cst_17 {dimension_numbers = #tpu.dot_dimension_numbers<[1], [0], [0], [1], [0, 0, 1, 1], [], []>} : vector<8x8xbf16>, vector<8x8xbf16>, vector<8x8xf32> -> vector<8x8xf32>
    %c0_18 = arith.constant 0 : index
    %c0_19 = arith.constant 0 : index
    %57 = vector.load %arg12[%c0_18, %c0_19] : memref<8x32xf32, #tpu.memory_space<vmem>>, vector<8x8xf32>
    tpu.vector_store %arg12[%c0_18, %c0_19], %56 {strides = array<i32>} : memref<8x32xf32, #tpu.memory_space<vmem>>, vector<8x8xf32>,
    %58 = vector.extract_strided_slice %37 {offsets = [0, 8], sizes = [8, 8], strides = [1, 1]} : vector<8x96xf32> to vector<8x8xf32>
    %59 = arith.truncf %58 : vector<8x8xf32> to vector<8x8xbf16>
    %60 = vector.extract_strided_slice %37 {offsets = [0, 40], sizes = [8, 8], strides = [1, 1]} : vector<8x96xf32> to vector<8x8xf32>
    %61 = arith.truncf %60 : vector<8x8xf32> to vector<8x8xbf16>
    %62 = vector.extract_strided_slice %37 {offsets = [0, 72], sizes = [8, 8], strides = [1, 1]} : vector<8x96xf32> to vector<8x8xf32>
    %63 = arith.truncf %62 : vector<8x8xf32> to vector<8x8xbf16>
    %cst_20 = arith.constant dense<0.000000e+00> : vector<8x8xf32>
    %64 = tpu.matmul %59, %61, %cst_20 {dimension_numbers = #tpu.dot_dimension_numbers<[1], [1], [0], [0], [0, 0, 1, 0], [], []>} : vector<8x8xbf16>, vector<8x8xbf16>, vector<8x8xf32> -> vector<8x8xf32>
    %cst_21 = arith.constant dense<0xFF800000> : vector<8xf32>
    %65 = vector.multi_reduction <maximumf>, %64, %cst_21 [1] : vector<8x8xf32> to vector<8xf32>
    %66 = vector.shape_cast %65 : vector<8xf32> to vector<8x1xf32>
    %67 = vector.broadcast %66 : vector<8x1xf32> to vector<8x8xf32>
    %68 = arith.subf %64, %67 : vector<8x8xf32>
    %69 = math.exp %68 : vector<8x8xf32>
    %cst_22 = arith.constant dense<0.000000e+00> : vector<8xf32>
    %70 = vector.multi_reduction <add>, %69, %cst_22 [1] : vector<8x8xf32> to vector<8xf32>
    %71 = vector.shape_cast %70 : vector<8xf32> to vector<8x1xf32>
    %72 = tpu.reciprocal %71 {approx = true} : vector<8x1xf32> -> vector<8x1xf32>
    %73 = vector.broadcast %72 : vector<8x1xf32> to vector<8x8xf32>
    %74 = arith.mulf %69, %73 : vector<8x8xf32>
    %75 = arith.truncf %74 : vector<8x8xf32> to vector<8x8xbf16>
    %cst_23 = arith.constant dense<0.000000e+00> : vector<8x8xf32>
    %76 = tpu.matmul %75, %63, %cst_23 {dimension_numbers = #tpu.dot_dimension_numbers<[1], [0], [0], [1], [0, 0, 1, 1], [], []>} : vector<8x8xbf16>, vector<8x8xbf16>, vector<8x8xf32> -> vector<8x8xf32>
    %c0_24 = arith.constant 0 : index
    %c8 = arith.constant 8 : index
    %77 = vector.load %arg12[%c0_24, %c8] : memref<8x32xf32, #tpu.memory_space<vmem>>, vector<8x8xf32>
    tpu.vector_store %arg12[%c0_24, %c8], %76 {strides = array<i32>} : memref<8x32xf32, #tpu.memory_space<vmem>>, vector<8x8xf32>,
    %78 = vector.extract_strided_slice %37 {offsets = [0, 16], sizes = [8, 8], strides = [1, 1]} : vector<8x96xf32> to vector<8x8xf32>
    %79 = arith.truncf %78 : vector<8x8xf32> to vector<8x8xbf16>
    %80 = vector.extract_strided_slice %37 {offsets = [0, 48], sizes = [8, 8], strides = [1, 1]} : vector<8x96xf32> to vector<8x8xf32>
    %81 = arith.truncf %80 : vector<8x8xf32> to vector<8x8xbf16>
    %82 = vector.extract_strided_slice %37 {offsets = [0, 80], sizes = [8, 8], strides = [1, 1]} : vector<8x96xf32> to vector<8x8xf32>
    %83 = arith.truncf %82 : vector<8x8xf32> to vector<8x8xbf16>
    %cst_25 = arith.constant dense<0.000000e+00> : vector<8x8xf32>
    %84 = tpu.matmul %79, %81, %cst_25 {dimension_numbers = #tpu.dot_dimension_numbers<[1], [1], [0], [0], [0, 0, 1, 0], [], []>} : vector<8x8xbf16>, vector<8x8xbf16>, vector<8x8xf32> -> vector<8x8xf32>
    %cst_26 = arith.constant dense<0xFF800000> : vector<8xf32>
    %85 = vector.multi_reduction <maximumf>, %84, %cst_26 [1] : vector<8x8xf32> to vector<8xf32>
    %86 = vector.shape_cast %85 : vector<8xf32> to vector<8x1xf32>
    %87 = vector.broadcast %86 : vector<8x1xf32> to vector<8x8xf32>
    %88 = arith.subf %84, %87 : vector<8x8xf32>
    %89 = math.exp %88 : vector<8x8xf32>
    %cst_27 = arith.constant dense<0.000000e+00> : vector<8xf32>
    %90 = vector.multi_reduction <add>, %89, %cst_27 [1] : vector<8x8xf32> to vector<8xf32>
    %91 = vector.shape_cast %90 : vector<8xf32> to vector<8x1xf32>
    %92 = tpu.reciprocal %91 {approx = true} : vector<8x1xf32> -> vector<8x1xf32>
    %93 = vector.broadcast %92 : vector<8x1xf32> to vector<8x8xf32>
    %94 = arith.mulf %89, %93 : vector<8x8xf32>
    %95 = arith.truncf %94 : vector<8x8xf32> to vector<8x8xbf16>
    %cst_28 = arith.constant dense<0.000000e+00> : vector<8x8xf32>
    %96 = tpu.matmul %95, %83, %cst_28 {dimension_numbers = #tpu.dot_dimension_numbers<[1], [0], [0], [1], [0, 0, 1, 1], [], []>} : vector<8x8xbf16>, vector<8x8xbf16>, vector<8x8xf32> -> vector<8x8xf32>
    %c0_29 = arith.constant 0 : index
    %c16 = arith.constant 16 : index
    %97 = vector.load %arg12[%c0_29, %c16] : memref<8x32xf32, #tpu.memory_space<vmem>>, vector<8x8xf32>
    tpu.vector_store %arg12[%c0_29, %c16], %96 {strides = array<i32>} : memref<8x32xf32, #tpu.memory_space<vmem>>, vector<8x8xf32>,
    %98 = vector.extract_strided_slice %37 {offsets = [0, 24], sizes = [8, 8], strides = [1, 1]} : vector<8x96xf32> to vector<8x8xf32>
    %99 = arith.truncf %98 : vector<8x8xf32> to vector<8x8xbf16>
    %100 = vector.extract_strided_slice %37 {offsets = [0, 56], sizes = [8, 8], strides = [1, 1]} : vector<8x96xf32> to vector<8x8xf32>
    %101 = arith.truncf %100 : vector<8x8xf32> to vector<8x8xbf16>
    %102 = vector.extract_strided_slice %37 {offsets = [0, 88], sizes = [8, 8], strides = [1, 1]} : vector<8x96xf32> to vector<8x8xf32>
    %103 = arith.truncf %102 : vector<8x8xf32> to vector<8x8xbf16>
    %cst_30 = arith.constant dense<0.000000e+00> : vector<8x8xf32>
    %104 = tpu.matmul %99, %101, %cst_30 {dimension_numbers = #tpu.dot_dimension_numbers<[1], [1], [0], [0], [0, 0, 1, 0], [], []>} : vector<8x8xbf16>, vector<8x8xbf16>, vector<8x8xf32> -> vector<8x8xf32>
    %cst_31 = arith.constant dense<0xFF800000> : vector<8xf32>
    %105 = vector.multi_reduction <maximumf>, %104, %cst_31 [1] : vector<8x8xf32> to vector<8xf32>
    %106 = vector.shape_cast %105 : vector<8xf32> to vector<8x1xf32>
    %107 = vector.broadcast %106 : vector<8x1xf32> to vector<8x8xf32>
    %108 = arith.subf %104, %107 : vector<8x8xf32>
    %109 = math.exp %108 : vector<8x8xf32>
    %cst_32 = arith.constant dense<0.000000e+00> : vector<8xf32>
    %110 = vector.multi_reduction <add>, %109, %cst_32 [1] : vector<8x8xf32> to vector<8xf32>
    %111 = vector.shape_cast %110 : vector<8xf32> to vector<8x1xf32>
    %112 = tpu.reciprocal %111 {approx = true} : vector<8x1xf32> -> vector<8x1xf32>
    %113 = vector.broadcast %112 : vector<8x1xf32> to vector<8x8xf32>
    %114 = arith.mulf %109, %113 : vector<8x8xf32>
    %115 = arith.truncf %114 : vector<8x8xf32> to vector<8x8xbf16>
    %cst_33 = arith.constant dense<0.000000e+00> : vector<8x8xf32>
    %116 = tpu.matmul %115, %103, %cst_33 {dimension_numbers = #tpu.dot_dimension_numbers<[1], [0], [0], [1], [0, 0, 1, 1], [], []>} : vector<8x8xbf16>, vector<8x8xbf16>, vector<8x8xf32> -> vector<8x8xf32>
    %c0_34 = arith.constant 0 : index
    %c24 = arith.constant 24 : index
    %117 = vector.load %arg12[%c0_34, %c24] : memref<8x32xf32, #tpu.memory_space<vmem>>, vector<8x8xf32>
    tpu.vector_store %arg12[%c0_34, %c24], %116 {strides = array<i32>} : memref<8x32xf32, #tpu.memory_space<vmem>>, vector<8x8xf32>,
    %c0_35 = arith.constant 0 : index
    %c0_36 = arith.constant 0 : index
    %118 = vector.load %arg12[%c0_35, %c0_36] : memref<8x32xf32, #tpu.memory_space<vmem>>, vector<8x32xf32>
    %119 = arith.truncf %118 : vector<8x32xf32> to vector<8x32xbf16>
    %c0_37 = arith.constant 0 : index
    %c0_38 = arith.constant 0 : index
    %120 = vector.load %arg5[%c0_37, %c0_38] : memref<32x32xbf16, #tpu.memory_space<vmem>>, vector<32x32xbf16>
    %cst_39 = arith.constant dense<0.000000e+00> : vector<8x32xf32>
    %121 = tpu.matmul %119, %120, %cst_39 {dimension_numbers = #tpu.dot_dimension_numbers<[1], [0], [0], [1], [0, 0, 1, 1], [], []>} : vector<8x32xbf16>, vector<32x32xbf16>, vector<8x32xf32> -> vector<8x32xf32>
    %c0_40 = arith.constant 0 : index
    %c0_41 = arith.constant 0 : index
    %122 = vector.load %arg6[%c0_40, %c0_41] : memref<1x32xf32, #tpu.memory_space<vmem>>, vector<1x32xf32>
    %123 = vector.broadcast %122 : vector<1x32xf32> to vector<8x32xf32>
    %124 = arith.addf %121, %123 : vector<8x32xf32>
    %125 = vector.broadcast %6 : vector<1x32xf32> to vector<8x32xf32>
    %126 = arith.mulf %125, %124 : vector<8x32xf32>
    %127 = arith.addf %1, %126 : vector<8x32xf32>
    %cst_42 = arith.constant dense<0.000000e+00> : vector<8xf32>
    %128 = vector.multi_reduction <add>, %127, %cst_42 [1] : vector<8x32xf32> to vector<8xf32>
    %129 = vector.shape_cast %128 : vector<8xf32> to vector<8x1xf32>
    %cst_43 = arith.constant 3.200000e+01 : f32
    %130 = vector.broadcast %cst_43 : f32 to vector<8x1xf32>
    %131 = arith.divf %129, %130 : vector<8x1xf32>
    %132 = vector.broadcast %131 : vector<8x1xf32> to vector<8x32xf32>
    %133 = arith.subf %127, %132 : vector<8x32xf32>
    %134 = arith.mulf %133, %133 : vector<8x32xf32>
    %cst_44 = arith.constant dense<0.000000e+00> : vector<8xf32>
    %135 = vector.multi_reduction <add>, %134, %cst_44 [1] : vector<8x32xf32> to vector<8xf32>
    %136 = vector.shape_cast %135 : vector<8xf32> to vector<8x1xf32>
    %cst_45 = arith.constant 3.200000e+01 : f32
    %137 = vector.broadcast %cst_45 : f32 to vector<8x1xf32>
    %138 = arith.divf %136, %137 : vector<8x1xf32>
    %139 = vector.broadcast %131 : vector<8x1xf32> to vector<8x32xf32>
    %140 = arith.subf %127, %139 : vector<8x32xf32>
    %cst_46 = arith.constant 9.99999974E-6 : f32
    %141 = vector.broadcast %cst_46 : f32 to vector<8x1xf32>
    %142 = arith.addf %138, %141 : vector<8x1xf32>
    %143 = math.rsqrt %142 : vector<8x1xf32>
    %144 = vector.broadcast %143 : vector<8x1xf32> to vector<8x32xf32>
    %145 = arith.mulf %140, %144 : vector<8x32xf32>
    %146 = vector.broadcast %8 : vector<1x32xf32> to vector<8x32xf32>
    %147 = arith.mulf %145, %146 : vector<8x32xf32>
    %148 = vector.broadcast %7 : vector<1x32xf32> to vector<8x32xf32>
    %149 = arith.addf %147, %148 : vector<8x32xf32>
    %150 = arith.truncf %149 : vector<8x32xf32> to vector<8x32xbf16>
    %c0_47 = arith.constant 0 : index
    %c0_48 = arith.constant 0 : index
    %151 = vector.load %arg7[%c0_47, %c0_48] : memref<32x128xbf16, #tpu.memory_space<vmem>>, vector<32x128xbf16>
    %cst_49 = arith.constant dense<0.000000e+00> : vector<8x128xf32>
    %152 = tpu.matmul %150, %151, %cst_49 {dimension_numbers = #tpu.dot_dimension_numbers<[1], [0], [0], [1], [0, 0, 1, 1], [], []>} : vector<8x32xbf16>, vector<32x128xbf16>, vector<8x128xf32> -> vector<8x128xf32>
    %c0_50 = arith.constant 0 : index
    %c0_51 = arith.constant 0 : index
    %153 = vector.load %arg8[%c0_50, %c0_51] : memref<1x128xf32, #tpu.memory_space<vmem>>, vector<1x128xf32>
    %154 = vector.broadcast %153 : vector<1x128xf32> to vector<8x128xf32>
    %155 = arith.addf %152, %154 : vector<8x128xf32>
    %cst_52 = arith.constant 5.000000e-01 : f32
    %156 = vector.broadcast %cst_52 : f32 to vector<8x128xf32>
    %157 = arith.mulf %156, %155 : vector<8x128xf32>
    %cst_53 = arith.constant 4.471500e-02 : f32
    %158 = vector.broadcast %cst_53 : f32 to vector<8x128xf32>
    %159 = arith.mulf %158, %155 : vector<8x128xf32>
    %160 = arith.mulf %159, %155 : vector<8x128xf32>
    %161 = arith.mulf %160, %155 : vector<8x128xf32>
    %162 = arith.addf %155, %161 : vector<8x128xf32>
    %cst_54 = arith.constant 0.797884583 : f32
    %163 = vector.broadcast %cst_54 : f32 to vector<8x128xf32>
    %164 = arith.mulf %163, %162 : vector<8x128xf32>
    %165 = math.tanh %164 : vector<8x128xf32>
    %cst_55 = arith.constant 1.000000e+00 : f32
    %166 = vector.broadcast %cst_55 : f32 to vector<8x128xf32>
    %167 = arith.addf %166, %165 : vector<8x128xf32>
    %168 = arith.mulf %157, %167 : vector<8x128xf32>
    %169 = arith.truncf %168 : vector<8x128xf32> to vector<8x128xbf16>
    %c0_56 = arith.constant 0 : index
    %c0_57 = arith.constant 0 : index
    %170 = vector.load %arg9[%c0_56, %c0_57] : memref<128x32xbf16, #tpu.memory_space<vmem>>, vector<128x32xbf16>
    %cst_58 = arith.constant dense<0.000000e+00> : vector<8x32xf32>
    %171 = tpu.matmul %169, %170, %cst_58 {dimension_numbers = #tpu.dot_dimension_numbers<[1], [0], [0], [1], [0, 0, 1, 1], [], []>} : vector<8x128xbf16>, vector<128x32xbf16>, vector<8x32xf32> -> vector<8x32xf32>
    %c0_59 = arith.constant 0 : index
    %c0_60 = arith.constant 0 : index
    %172 = vector.load %arg10[%c0_59, %c0_60] : memref<1x32xf32, #tpu.memory_space<vmem>>, vector<1x32xf32>
    %173 = vector.broadcast %172 : vector<1x32xf32> to vector<8x32xf32>
    %174 = arith.addf %171, %173 : vector<8x32xf32>
    %175 = vector.broadcast %9 : vector<1x32xf32> to vector<8x32xf32>
    %176 = arith.mulf %175, %174 : vector<8x32xf32>
    %177 = arith.addf %127, %176 : vector<8x32xf32>
    %c0_61 = arith.constant 0 : index
    %c0_62 = arith.constant 0 : index
    %c0_63 = arith.constant 0 : index
    %178 = vector.load %arg11[%c0_61, %c0_62, %c0_63] : memref<1x8x32xf32, #tpu.memory_space<vmem>>, vector<1x8x32xf32>
    %179 = vector.shape_cast %178 : vector<1x8x32xf32> to vector<8x32xf32>
    %180 = vector.shape_cast %177 : vector<8x32xf32> to vector<1x8x32xf32>
    tpu.vector_store %arg11[%c0_61, %c0_62, %c0_63], %180 {strides = array<i32>} : memref<1x8x32xf32, #tpu.memory_space<vmem>>, vector<1x8x32xf32>,
    return
  }
  func.func @transform_0(%arg0: i32) -> (i32, i32, i32) {
    %c0_i32 = arith.constant 0 : i32
    %c0_i32_0 = arith.constant 0 : i32
    %c0_i32_1 = arith.constant 0 : i32
    return %arg0, %c0_i32, %c0_i32_0 : i32, i32, i32
  }
  func.func @transform_1(%arg0: i32) -> (i32, i32, i32) {
    %c0_i32 = arith.constant 0 : i32
    %c0_i32_0 = arith.constant 0 : i32
    %c0_i32_1 = arith.constant 0 : i32
    return %arg0, %c0_i32, %c0_i32_0 : i32, i32, i32
  }
  func.func @transform_2(%arg0: i32) -> (i32, i32) {
    %c0_i32 = arith.constant 0 : i32
    %c0_i32_0 = arith.constant 0 : i32
    %c0_i32_1 = arith.constant 0 : i32
    return %c0_i32, %c0_i32_0 : i32, i32
  }
  func.func @transform_3(%arg0: i32) -> (i32, i32) {
    %c0_i32 = arith.constant 0 : i32
    %c0_i32_0 = arith.constant 0 : i32
    %c0_i32_1 = arith.constant 0 : i32
    return %c0_i32, %c0_i32_0 : i32, i32
  }
  func.func @transform_4(%arg0: i32) -> (i32, i32) {
    %c0_i32 = arith.constant 0 : i32
    %c0_i32_0 = arith.constant 0 : i32
    %c0_i32_1 = arith.constant 0 : i32
    return %c0_i32, %c0_i32_0 : i32, i32
  }
  func.func @transform_5(%arg0: i32) -> (i32, i32) {
    %c0_i32 = arith.constant 0 : i32
    %c0_i32_0 = arith.constant 0 : i32
    %c0_i32_1 = arith.constant 0 : i32
    return %c0_i32, %c0_i32_0 : i32, i32
  }
  func.func @transform_6(%arg0: i32) -> (i32, i32) {
    %c0_i32 = arith.constant 0 : i32
    %c0_i32_0 = arith.constant 0 : i32
    %c0_i32_1 = arith.constant 0 : i32
    return %c0_i32, %c0_i32_0 : i32, i32
  }
  func.func @transform_7(%arg0: i32) -> (i32, i32) {
    %c0_i32 = arith.constant 0 : i32
    %c0_i32_0 = arith.constant 0 : i32
    %c0_i32_1 = arith.constant 0 : i32
    return %c0_i32, %c0_i32_0 : i32, i32
  }
  func.func @transform_8(%arg0: i32) -> (i32, i32) {
    %c0_i32 = arith.constant 0 : i32
    %c0_i32_0 = arith.constant 0 : i32
    %c0_i32_1 = arith.constant 0 : i32
    return %c0_i32, %c0_i32_0 : i32, i32
  }
  func.func @transform_9(%arg0: i32) -> (i32, i32) {
    %c0_i32 = arith.constant 0 : i32
    %c0_i32_0 = arith.constant 0 : i32
    %c0_i32_1 = arith.constant 0 : i32
    return %c0_i32, %c0_i32_0 : i32, i32
  }
  func.func @transform_10(%arg0: i32) -> (i32, i32, i32) {
    %c0_i32 = arith.constant 0 : i32
    %c0_i32_0 = arith.constant 0 : i32
    %c0_i32_1 = arith.constant 0 : i32
    return %arg0, %c0_i32, %c0_i32_0 : i32, i32, i32
  }
}

module attributes {stable_mosaic.version = 11 : i64} {
  func.func @dit_block_kernel(%arg0: i32, %arg1: memref<1x8x32xf32, #tpu.memory_space<vmem>>, %arg2: memref<1x6x32xf32, #tpu.memory_space<vmem>>, %arg3: memref<32x96xbf16, #tpu.memory_space<vmem>>, %arg4: memref<1x96xf32, #tpu.memory_space<vmem>>, %arg5: memref<32x32xbf16, #tpu.memory_space<vmem>>, %arg6: memref<1x32xf32, #tpu.memory_space<vmem>>, %arg7: memref<32x128xbf16, #tpu.memory_space<vmem>>, %arg8: memref<1x128xf32, #tpu.memory_space<vmem>>, %arg9: memref<128x32xbf16, #tpu.memory_space<vmem>>, %arg10: memref<1x32xf32, #tpu.memory_space<vmem>>, %arg11: memref<1x8x32xf32, #tpu.memory_space<vmem>>, %arg12: memref<8x32xf32, #tpu.memory_space<vmem>>) attributes {dimension_semantics = [#tpu.dimension_semantics<parallel>], iteration_bounds = array<i64: 2>, scalar_prefetch = 0 : i64, scratch_operands = 1 : i64, tpu.core_type = #tpu.core_type<tc>, window_params = [{transform_indices = @transform_0, window_bounds = array<i64: 1, 8, 32>}, {transform_indices = @transform_1, window_bounds = array<i64: 1, 6, 32>}, {pipeline_mode = #tpu.pipeline_mode<synchronous>, transform_indices = @transform_2, window_bounds = array<i64: 32, 96>}, {pipeline_mode = #tpu.pipeline_mode<synchronous>, transform_indices = @transform_3, window_bounds = array<i64: 1, 96>}, {pipeline_mode = #tpu.pipeline_mode<synchronous>, transform_indices = @transform_4, window_bounds = array<i64: 32, 32>}, {pipeline_mode = #tpu.pipeline_mode<synchronous>, transform_indices = @transform_5, window_bounds = array<i64: 1, 32>}, {pipeline_mode = #tpu.pipeline_mode<synchronous>, transform_indices = @transform_6, window_bounds = array<i64: 32, 128>}, {pipeline_mode = #tpu.pipeline_mode<synchronous>, transform_indices = @transform_7, window_bounds = array<i64: 1, 128>}, {pipeline_mode = #tpu.pipeline_mode<synchronous>, transform_indices = @transform_8, window_bounds = array<i64: 128, 32>}, {pipeline_mode = #tpu.pipeline_mode<synchronous>, transform_indices = @transform_9, window_bounds = array<i64: 1, 32>}, {transform_indices = @transform_10, window_bounds = array<i64: 1, 8, 32>}]} {
    %c0 = arith.constant 0 : index
    %c0_0 = arith.constant 0 : index
    %c0_1 = arith.constant 0 : index
    %0 = vector.load %arg1[%c0, %c0_0, %c0_1] : memref<1x8x32xf32, #tpu.memory_space<vmem>>, vector<1x8x32xf32>
    %1 = vector.shape_cast %0 : vector<1x8x32xf32> to vector<8x32xf32>
    %c0_2 = arith.constant 0 : index
    %c0_3 = arith.constant 0 : index
    %c0_4 = arith.constant 0 : index
    %2 = vector.load %arg2[%c0_2, %c0_3, %c0_4] : memref<1x6x32xf32, #tpu.memory_space<vmem>>, vector<1x6x32xf32>
    %3 = vector.shape_cast %2 : vector<1x6x32xf32> to vector<6x32xf32>
    %4 = vector.extract_strided_slice %3 {offsets = [0, 0], sizes = [1, 32], strides = [1, 1]} : vector<6x32xf32> to vector<1x32xf32>
    %5 = vector.extract_strided_slice %3 {offsets = [1, 0], sizes = [1, 32], strides = [1, 1]} : vector<6x32xf32> to vector<1x32xf32>
    %6 = vector.extract_strided_slice %3 {offsets = [2, 0], sizes = [1, 32], strides = [1, 1]} : vector<6x32xf32> to vector<1x32xf32>
    %7 = vector.extract_strided_slice %3 {offsets = [3, 0], sizes = [1, 32], strides = [1, 1]} : vector<6x32xf32> to vector<1x32xf32>
    %8 = vector.extract_strided_slice %3 {offsets = [4, 0], sizes = [1, 32], strides = [1, 1]} : vector<6x32xf32> to vector<1x32xf32>
    %9 = vector.extract_strided_slice %3 {offsets = [5, 0], sizes = [1, 32], strides = [1, 1]} : vector<6x32xf32> to vector<1x32xf32>
    %cst = arith.constant dense<0.000000e+00> : vector<8xf32>
    %10 = vector.multi_reduction <add>, %1, %cst [1] : vector<8x32xf32> to vector<8xf32>
    %11 = vector.shape_cast %10 : vector<8xf32> to vector<8x1xf32>
    %cst_5 = arith.constant 3.200000e+01 : f32
    %12 = vector.broadcast %cst_5 : f32 to vector<8x1xf32>
    %13 = arith.divf %11, %12 : vector<8x1xf32>
    %14 = vector.broadcast %13 : vector<8x1xf32> to vector<8x32xf32>
    %15 = arith.subf %1, %14 : vector<8x32xf32>
    %16 = arith.mulf %15, %15 : vector<8x32xf32>
    %cst_6 = arith.constant dense<0.000000e+00> : vector<8xf32>
    %17 = vector.multi_reduction <add>, %16, %cst_6 [1] : vector<8x32xf32> to vector<8xf32>
    %18 = vector.shape_cast %17 : vector<8xf32> to vector<8x1xf32>
    %cst_7 = arith.constant 3.200000e+01 : f32
    %19 = vector.broadcast %cst_7 : f32 to vector<8x1xf32>
    %20 = arith.divf %18, %19 : vector<8x1xf32>
    %21 = vector.broadcast %13 : vector<8x1xf32> to vector<8x32xf32>
    %22 = arith.subf %1, %21 : vector<8x32xf32>
    %cst_8 = arith.constant 9.99999974E-6 : f32
    %23 = vector.broadcast %cst_8 : f32 to vector<8x1xf32>
    %24 = arith.addf %20, %23 : vector<8x1xf32>
    %25 = math.rsqrt %24 : vector<8x1xf32>
    %26 = vector.broadcast %25 : vector<8x1xf32> to vector<8x32xf32>
    %27 = arith.mulf %22, %26 : vector<8x32xf32>
    %28 = vector.broadcast %5 : vector<1x32xf32> to vector<8x32xf32>
    %29 = arith.mulf %27, %28 : vector<8x32xf32>
    %30 = vector.broadcast %4 : vector<1x32xf32> to vector<8x32xf32>
    %31 = arith.addf %29, %30 : vector<8x32xf32>
    %32 = arith.truncf %31 : vector<8x32xf32> to vector<8x32xbf16>
    %c0_9 = arith.constant 0 : index
    %c0_10 = arith.constant 0 : index
    %33 = vector.load %arg3[%c0_9, %c0_10] : memref<32x96xbf16, #tpu.memory_space<vmem>>, vector<32x96xbf16>
    %cst_11 = arith.constant dense<0.000000e+00> : vector<8x96xf32>
    %34 = tpu.matmul %32, %33, %cst_11 {dimension_numbers = #tpu.dot_dimension_numbers<[1], [0], [0], [1], [0, 0, 1, 1], [], []>} : vector<8x32xbf16>, vector<32x96xbf16>, vector<8x96xf32> -> vector<8x96xf32>
    %c0_12 = arith.constant 0 : index
    %c0_13 = arith.constant 0 : index
    %35 = vector.load %arg4[%c0_12, %c0_13] : memref<1x96xf32, #tpu.memory_space<vmem>>, vector<1x96xf32>
    %36 = vector.broadcast %35 : vector<1x96xf32> to vector<8x96xf32>
    %37 = arith.addf %34, %36 : vector<8x96xf32>
    %38 = vector.extract_strided_slice %37 {offsets = [0, 0], sizes = [8, 8], strides = [1, 1]} : vector<8x96xf32> to vector<8x8xf32>
    %39 = arith.truncf %38 : vector<8x8xf32> to vector<8x8xbf16>
    %40 = vector.extract_strided_slice %37 {offsets = [0, 32], sizes = [8, 8], strides = [1, 1]} : vector<8x96xf32> to vector<8x8xf32>
    %41 = arith.truncf %40 : vector<8x8xf32> to vector<8x8xbf16>
    %42 = vector.extract_strided_slice %37 {offsets = [0, 64], sizes = [8, 8], strides = [1, 1]} : vector<8x96xf32> to vector<8x8xf32>
    %43 = arith.truncf %42 : vector<8x8xf32> to vector<8x8xbf16>
    %cst_14 = arith.constant dense<0.000000e+00> : vector<8x8xf32>
    %44 = tpu.matmul %39, %41, %cst_14 {dimension_numbers = #tpu.dot_dimension_numbers<[1], [1], [0], [0], [0, 0, 1, 0], [], []>} : vector<8x8xbf16>, vector<8x8xbf16>, vector<8x8xf32> -> vector<8x8xf32>
    %cst_15 = arith.constant dense<0xFF800000> : vector<8xf32>
    %45 = vector.multi_reduction <maximumf>, %44, %cst_15 [1] : vector<8x8xf32> to vector<8xf32>
    %46 = vector.shape_cast %45 : vector<8xf32> to vector<8x1xf32>
    %47 = vector.broadcast %46 : vector<8x1xf32> to vector<8x8xf32>
    %48 = arith.subf %44, %47 : vector<8x8xf32>
    %49 = math.exp %48 : vector<8x8xf32>
    %cst_16 = arith.constant dense<0.000000e+00> : vector<8xf32>
    %50 = vector.multi_reduction <add>, %49, %cst_16 [1] : vector<8x8xf32> to vector<8xf32>
    %51 = vector.shape_cast %50 : vector<8xf32> to vector<8x1xf32>
    %52 = tpu.reciprocal %51 {approx = true} : vector<8x1xf32> -> vector<8x1xf32>
    %53 = vector.broadcast %52 : vector<8x1xf32> to vector<8x8xf32>
    %54 = arith.mulf %49, %53 : vector<8x8xf32>
    %55 = arith.truncf %54 : vector<8x8xf32> to vector<8x8xbf16>
    %cst_17 = arith.constant dense<0.000000e+00> : vector<8x8xf32>
    %56 = tpu.matmul %55, %43, %cst_17 {dimension_numbers = #tpu.dot_dimension_numbers<[1], [0], [0], [1], [0, 0, 1, 1], [], []>} : vector<8x8xbf16>, vector<8x8xbf16>, vector<8x8xf32> -> vector<8x8xf32>
    %c0_18 = arith.constant 0 : index
    %c0_19 = arith.constant 0 : index
    %57 = vector.load %arg12[%c0_18, %c0_19] : memref<8x32xf32, #tpu.memory_space<vmem>>, vector<8x8xf32>
    tpu.vector_store %arg12[%c0_18, %c0_19], %56 {strides = array<i32>} : memref<8x32xf32, #tpu.memory_space<vmem>>, vector<8x8xf32>,
    %58 = vector.extract_strided_slice %37 {offsets = [0, 8], sizes = [8, 8], strides = [1, 1]} : vector<8x96xf32> to vector<8x8xf32>
    %59 = arith.truncf %58 : vector<8x8xf32> to vector<8x8xbf16>
    %60 = vector.extract_strided_slice %37 {offsets = [0, 40], sizes = [8, 8], strides = [1, 1]} : vector<8x96xf32> to vector<8x8xf32>
    %61 = arith.truncf %60 : vector<8x8xf32> to vector<8x8xbf16>
    %62 = vector.extract_strided_slice %37 {offsets = [0, 72], sizes = [8, 8], strides = [1, 1]} : vector<8x96xf32> to vector<8x8xf32>
    %63 = arith.truncf %62 : vector<8x8xf32> to vector<8x8xbf16>
    %cst_20 = arith.constant dense<0.000000e+00> : vector<8x8xf32>
    %64 = tpu.matmul %59, %61, %cst_20 {dimension_numbers = #tpu.dot_dimension_numbers<[1], [1], [0], [0], [0, 0, 1, 0], [], []>} : vector<8x8xbf16>, vector<8x8xbf16>, vector<8x8xf32> -> vector<8x8xf32>
    %cst_21 = arith.constant dense<0xFF800000> : vector<8xf32>
    %65 = vector.multi_reduction <maximumf>, %64, %cst_21 [1] : vector<8x8xf32> to vector<8xf32>
    %66 = vector.shape_cast %65 : vector<8xf32> to vector<8x1xf32>
    %67 = vector.broadcast %66 : vector<8x1xf32> to vector<8x8xf32>
    %68 = arith.subf %64, %67 : vector<8x8xf32>
    %69 = math.exp %68 : vector<8x8xf32>
    %cst_22 = arith.constant dense<0.000000e+00> : vector<8xf32>
    %70 = vector.multi_reduction <add>, %69, %cst_22 [1] : vector<8x8xf32> to vector<8xf32>
    %71 = vector.shape_cast %70 : vector<8xf32> to vector<8x1xf32>
    %72 = tpu.reciprocal %71 {approx = true} : vector<8x1xf32> -> vector<8x1xf32>
    %73 = vector.broadcast %72 : vector<8x1xf32> to vector<8x8xf32>
    %74 = arith.mulf %69, %73 : vector<8x8xf32>
    %75 = arith.truncf %74 : vector<8x8xf32> to vector<8x8xbf16>
    %cst_23 = arith.constant dense<0.000000e+00> : vector<8x8xf32>
    %76 = tpu.matmul %75, %63, %cst_23 {dimension_numbers = #tpu.dot_dimension_numbers<[1], [0], [0], [1], [0, 0, 1, 1], [], []>} : vector<8x8xbf16>, vector<8x8xbf16>, vector<8x8xf32> -> vector<8x8xf32>
    %c0_24 = arith.constant 0 : index
    %c8 = arith.constant 8 : index
    %77 = vector.load %arg12[%c0_24, %c8] : memref<8x32xf32, #tpu.memory_space<vmem>>, vector<8x8xf32>
    tpu.vector_store %arg12[%c0_24, %c8], %76 {strides = array<i32>} : memref<8x32xf32, #tpu.memory_space<vmem>>, vector<8x8xf32>,
    %78 = vector.extract_strided_slice %37 {offsets = [0, 16], sizes = [8, 8], strides = [1, 1]} : vector<8x96xf32> to vector<8x8xf32>
    %79 = arith.truncf %78 : vector<8x8xf32> to vector<8x8xbf16>
    %80 = vector.extract_strided_slice %37 {offsets = [0, 48], sizes = [8, 8], strides = [1, 1]} : vector<8x96xf32> to vector<8x8xf32>
    %81 = arith.truncf %80 : vector<8x8xf32> to vector<8x8xbf16>
    %82 = vector.extract_strided_slice %37 {offsets = [0, 80], sizes = [8, 8], strides = [1, 1]} : vector<8x96xf32> to vector<8x8xf32>
    %83 = arith.truncf %82 : vector<8x8xf32> to vector<8x8xbf16>
    %cst_25 = arith.constant dense<0.000000e+00> : vector<8x8xf32>
    %84 = tpu.matmul %79, %81, %cst_25 {dimension_numbers = #tpu.dot_dimension_numbers<[1], [1], [0], [0], [0, 0, 1, 0], [], []>} : vector<8x8xbf16>, vector<8x8xbf16>, vector<8x8xf32> -> vector<8x8xf32>
    %cst_26 = arith.constant dense<0xFF800000> : vector<8xf32>
    %85 = vector.multi_reduction <maximumf>, %84, %cst_26 [1] : vector<8x8xf32> to vector<8xf32>
    %86 = vector.shape_cast %85 : vector<8xf32> to vector<8x1xf32>
    %87 = vector.broadcast %86 : vector<8x1xf32> to vector<8x8xf32>
    %88 = arith.subf %84, %87 : vector<8x8xf32>
    %89 = math.exp %88 : vector<8x8xf32>
    %cst_27 = arith.constant dense<0.000000e+00> : vector<8xf32>
    %90 = vector.multi_reduction <add>, %89, %cst_27 [1] : vector<8x8xf32> to vector<8xf32>
    %91 = vector.shape_cast %90 : vector<8xf32> to vector<8x1xf32>
    %92 = tpu.reciprocal %91 {approx = true} : vector<8x1xf32> -> vector<8x1xf32>
    %93 = vector.broadcast %92 : vector<8x1xf32> to vector<8x8xf32>
    %94 = arith.mulf %89, %93 : vector<8x8xf32>
    %95 = arith.truncf %94 : vector<8x8xf32> to vector<8x8xbf16>
    %cst_28 = arith.constant dense<0.000000e+00> : vector<8x8xf32>
    %96 = tpu.matmul %95, %83, %cst_28 {dimension_numbers = #tpu.dot_dimension_numbers<[1], [0], [0], [1], [0, 0, 1, 1], [], []>} : vector<8x8xbf16>, vector<8x8xbf16>, vector<8x8xf32> -> vector<8x8xf32>
    %c0_29 = arith.constant 0 : index
    %c16 = arith.constant 16 : index
    %97 = vector.load %arg12[%c0_29, %c16] : memref<8x32xf32, #tpu.memory_space<vmem>>, vector<8x8xf32>
    tpu.vector_store %arg12[%c0_29, %c16], %96 {strides = array<i32>} : memref<8x32xf32, #tpu.memory_space<vmem>>, vector<8x8xf32>,
    %98 = vector.extract_strided_slice %37 {offsets = [0, 24], sizes = [8, 8], strides = [1, 1]} : vector<8x96xf32> to vector<8x8xf32>
    %99 = arith.truncf %98 : vector<8x8xf32> to vector<8x8xbf16>
    %100 = vector.extract_strided_slice %37 {offsets = [0, 56], sizes = [8, 8], strides = [1, 1]} : vector<8x96xf32> to vector<8x8xf32>
    %101 = arith.truncf %100 : vector<8x8xf32> to vector<8x8xbf16>
    %102 = vector.extract_strided_slice %37 {offsets = [0, 88], sizes = [8, 8], strides = [1, 1]} : vector<8x96xf32> to vector<8x8xf32>
    %103 = arith.truncf %102 : vector<8x8xf32> to vector<8x8xbf16>
    %cst_30 = arith.constant dense<0.000000e+00> : vector<8x8xf32>
    %104 = tpu.matmul %99, %101, %cst_30 {dimension_numbers = #tpu.dot_dimension_numbers<[1], [1], [0], [0], [0, 0, 1, 0], [], []>} : vector<8x8xbf16>, vector<8x8xbf16>, vector<8x8xf32> -> vector<8x8xf32>
    %cst_31 = arith.constant dense<0xFF800000> : vector<8xf32>
    %105 = vector.multi_reduction <maximumf>, %104, %cst_31 [1] : vector<8x8xf32> to vector<8xf32>
    %106 = vector.shape_cast %105 : vector<8xf32> to vector<8x1xf32>
    %107 = vector.broadcast %106 : vector<8x1xf32> to vector<8x8xf32>
    %108 = arith.subf %104, %107 : vector<8x8xf32>
    %109 = math.exp %108 : vector<8x8xf32>
    %cst_32 = arith.constant dense<0.000000e+00> : vector<8xf32>
    %110 = vector.multi_reduction <add>, %109, %cst_32 [1] : vector<8x8xf32> to vector<8xf32>
    %111 = vector.shape_cast %110 : vector<8xf32> to vector<8x1xf32>
    %112 = tpu.reciprocal %111 {approx = true} : vector<8x1xf32> -> vector<8x1xf32>
    %113 = vector.broadcast %112 : vector<8x1xf32> to vector<8x8xf32>
    %114 = arith.mulf %109, %113 : vector<8x8xf32>
    %115 = arith.truncf %114 : vector<8x8xf32> to vector<8x8xbf16>
    %cst_33 = arith.constant dense<0.000000e+00> : vector<8x8xf32>
    %116 = tpu.matmul %115, %103, %cst_33 {dimension_numbers = #tpu.dot_dimension_numbers<[1], [0], [0], [1], [0, 0, 1, 1], [], []>} : vector<8x8xbf16>, vector<8x8xbf16>, vector<8x8xf32> -> vector<8x8xf32>
    %c0_34 = arith.constant 0 : index
    %c24 = arith.constant 24 : index
    %117 = vector.load %arg12[%c0_34, %c24] : memref<8x32xf32, #tpu.memory_space<vmem>>, vector<8x8xf32>
    tpu.vector_store %arg12[%c0_34, %c24], %116 {strides = array<i32>} : memref<8x32xf32, #tpu.memory_space<vmem>>, vector<8x8xf32>,
    %c0_35 = arith.constant 0 : index
    %c0_36 = arith.constant 0 : index
    %118 = vector.load %arg12[%c0_35, %c0_36] : memref<8x32xf32, #tpu.memory_space<vmem>>, vector<8x32xf32>
    %119 = arith.truncf %118 : vector<8x32xf32> to vector<8x32xbf16>
    %c0_37 = arith.constant 0 : index
    %c0_38 = arith.constant 0 : index
    %120 = vector.load %arg5[%c0_37, %c0_38] : memref<32x32xbf16, #tpu.memory_space<vmem>>, vector<32x32xbf16>
    %cst_39 = arith.constant dense<0.000000e+00> : vector<8x32xf32>
    %121 = tpu.matmul %119, %120, %cst_39 {dimension_numbers = #tpu.dot_dimension_numbers<[1], [0], [0], [1], [0, 0, 1, 1], [], []>} : vector<8x32xbf16>, vector<32x32xbf16>, vector<8x32xf32> -> vector<8x32xf32>
    %c0_40 = arith.constant 0 : index
    %c0_41 = arith.constant 0 : index
    %122 = vector.load %arg6[%c0_40, %c0_41] : memref<1x32xf32, #tpu.memory_space<vmem>>, vector<1x32xf32>
    %123 = vector.broadcast %122 : vector<1x32xf32> to vector<8x32xf32>
    %124 = arith.addf %121, %123 : vector<8x32xf32>
    %125 = vector.broadcast %6 : vector<1x32xf32> to vector<8x32xf32>
    %126 = arith.mulf %125, %124 : vector<8x32xf32>
    %127 = arith.addf %1, %126 : vector<8x32xf32>
    %cst_42 = arith.constant dense<0.000000e+00> : vector<8xf32>
    %128 = vector.multi_reduction <add>, %127, %cst_42 [1] : vector<8x32xf32> to vector<8xf32>
    %129 = vector.shape_cast %128 : vector<8xf32> to vector<8x1xf32>
    %cst_43 = arith.constant 3.200000e+01 : f32
    %130 = vector.broadcast %cst_43 : f32 to vector<8x1xf32>
    %131 = arith.divf %129, %130 : vector<8x1xf32>
    %132 = vector.broadcast %131 : vector<8x1xf32> to vector<8x32xf32>
    %133 = arith.subf %127, %132 : vector<8x32xf32>
    %134 = arith.mulf %133, %133 : vector<8x32xf32>
    %cst_44 = arith.constant dense<0.000000e+00> : vector<8xf32>
    %135 = vector.multi_reduction <add>, %134, %cst_44 [1] : vector<8x32xf32> to vector<8xf32>
    %136 = vector.shape_cast %135 : vector<8xf32> to vector<8x1xf32>
    %cst_45 = arith.constant 3.200000e+01 : f32
    %137 = vector.broadcast %cst_45 : f32 to vector<8x1xf32>
    %138 = arith.divf %136, %137 : vector<8x1xf32>
    %139 = vector.broadcast %131 : vector<8x1xf32> to vector<8x32xf32>
    %140 = arith.subf %127, %139 : vector<8x32xf32>
    %cst_46 = arith.constant 9.99999974E-6 : f32
    %141 = vector.broadcast %cst_46 : f32 to vector<8x1xf32>
    %142 = arith.addf %138, %141 : vector<8x1xf32>
    %143 = math.rsqrt %142 : vector<8x1xf32>
    %144 = vector.broadcast %143 : vector<8x1xf32> to vector<8x32xf32>
    %145 = arith.mulf %140, %144 : vector<8x32xf32>
    %146 = vector.broadcast %8 : vector<1x32xf32> to vector<8x32xf32>
    %147 = arith.mulf %145, %146 : vector<8x32xf32>
    %148 = vector.broadcast %7 : vector<1x32xf32> to vector<8x32xf32>
    %149 = arith.addf %147, %148 : vector<8x32xf32>
    %150 = arith.truncf %149 : vector<8x32xf32> to vector<8x32xbf16>
    %c0_47 = arith.constant 0 : index
    %c0_48 = arith.constant 0 : index
    %151 = vector.load %arg7[%c0_47, %c0_48] : memref<32x128xbf16, #tpu.memory_space<vmem>>, vector<32x128xbf16>
    %cst_49 = arith.constant dense<0.000000e+00> : vector<8x128xf32>
    %152 = tpu.matmul %150, %151, %cst_49 {dimension_numbers = #tpu.dot_dimension_numbers<[1], [0], [0], [1], [0, 0, 1, 1], [], []>} : vector<8x32xbf16>, vector<32x128xbf16>, vector<8x128xf32> -> vector<8x128xf32>
    %c0_50 = arith.constant 0 : index
    %c0_51 = arith.constant 0 : index
    %153 = vector.load %arg8[%c0_50, %c0_51] : memref<1x128xf32, #tpu.memory_space<vmem>>, vector<1x128xf32>
    %154 = vector.broadcast %153 : vector<1x128xf32> to vector<8x128xf32>
    %155 = arith.addf %152, %154 : vector<8x128xf32>
    %cst_52 = arith.constant 5.000000e-01 : f32
    %156 = vector.broadcast %cst_52 : f32 to vector<8x128xf32>
    %157 = arith.mulf %156, %155 : vector<8x128xf32>
    %cst_53 = arith.constant 4.471500e-02 : f32
    %158 = vector.broadcast %cst_53 : f32 to vector<8x128xf32>
    %159 = arith.mulf %158, %155 : vector<8x128xf32>
    %160 = arith.mulf %159, %155 : vector<8x128xf32>
    %161 = arith.mulf %160, %155 : vector<8x128xf32>
    %162 = arith.addf %155, %161 : vector<8x128xf32>
    %cst_54 = arith.constant 0.797884583 : f32
    %163 = vector.broadcast %cst_54 : f32 to vector<8x128xf32>
    %164 = arith.mulf %163, %162 : vector<8x128xf32>
    %165 = math.tanh %164 : vector<8x128xf32>
    %cst_55 = arith.constant 1.000000e+00 : f32
    %166 = vector.broadcast %cst_55 : f32 to vector<8x128xf32>
    %167 = arith.addf %166, %165 : vector<8x128xf32>
    %168 = arith.mulf %157, %167 : vector<8x128xf32>
    %169 = arith.truncf %168 : vector<8x128xf32> to vector<8x128xbf16>
    %c0_56 = arith.constant 0 : index
    %c0_57 = arith.constant 0 : index
    %170 = vector.load %arg9[%c0_56, %c0_57] : memref<128x32xbf16, #tpu.memory_space<vmem>>, vector<128x32xbf16>
    %cst_58 = arith.constant dense<0.000000e+00> : vector<8x32xf32>
    %171 = tpu.matmul %169, %170, %cst_58 {dimension_numbers = #tpu.dot_dimension_numbers<[1], [0], [0], [1], [0, 0, 1, 1], [], []>} : vector<8x128xbf16>, vector<128x32xbf16>, vector<8x32xf32> -> vector<8x32xf32>
    %c0_59 = arith.constant 0 : index
    %c0_60 = arith.constant 0 : index
    %172 = vector.load %arg10[%c0_59, %c0_60] : memref<1x32xf32, #tpu.memory_space<vmem>>, vector<1x32xf32>
    %173 = vector.broadcast %172 : vector<1x32xf32> to vector<8x32xf32>
    %174 = arith.addf %171, %173 : vector<8x32xf32>
    %175 = vector.broadcast %9 : vector<1x32xf32> to vector<8x32xf32>
    %176 = arith.mulf %175, %174 : vector<8x32xf32>
    %177 = arith.addf %127, %176 : vector<8x32xf32>
    %c0_61 = arith.constant 0 : index
    %c0_62 = arith.constant 0 : index
    %c0_63 = arith.constant 0 : index
    %178 = vector.load %arg11[%c0_61, %c0_62, %c0_63] : memref<1x8x32xf32, #tpu.memory_space<vmem>>, vector<1x8x32xf32>
    %179 = vector.shape_cast %178 : vector<1x8x32xf32> to vector<8x32xf32>
    %180 = vector.shape_cast %177 : vector<8x32xf32> to vector<1x8x32xf32>
    tpu.vector_store %arg11[%c0_61, %c0_62, %c0_63], %180 {strides = array<i32>} : memref<1x8x32xf32, #tpu.memory_space<vmem>>, vector<1x8x32xf32>,
    return
  }
  func.func @transform_0(%arg0: i32) -> (i32, i32, i32) {
    %c0_i32 = arith.constant 0 : i32
    %c0_i32_0 = arith.constant 0 : i32
    %c0_i32_1 = arith.constant 0 : i32
    return %arg0, %c0_i32, %c0_i32_0 : i32, i32, i32
  }
  func.func @transform_1(%arg0: i32) -> (i32, i32, i32) {
    %c0_i32 = arith.constant 0 : i32
    %c0_i32_0 = arith.constant 0 : i32
    %c0_i32_1 = arith.constant 0 : i32
    return %arg0, %c0_i32, %c0_i32_0 : i32, i32, i32
  }
  func.func @transform_2(%arg0: i32) -> (i32, i32) {
    %c0_i32 = arith.constant 0 : i32
    %c0_i32_0 = arith.constant 0 : i32
    %c0_i32_1 = arith.constant 0 : i32
    return %c0_i32, %c0_i32_0 : i32, i32
  }
  func.func @transform_3(%arg0: i32) -> (i32, i32) {
    %c0_i32 = arith.constant 0 : i32
    %c0_i32_0 = arith.constant 0 : i32
    %c0_i32_1 = arith.constant 0 : i32
    return %c0_i32, %c0_i32_0 : i32, i32
  }
  func.func @transform_4(%arg0: i32) -> (i32, i32) {
    %c0_i32 = arith.constant 0 : i32
    %c0_i32_0 = arith.constant 0 : i32
    %c0_i32_1 = arith.constant 0 : i32
    return %c0_i32, %c0_i32_0 : i32, i32
  }
  func.func @transform_5(%arg0: i32) -> (i32, i32) {
    %c0_i32 = arith.constant 0 : i32
    %c0_i32_0 = arith.constant 0 : i32
    %c0_i32_1 = arith.constant 0 : i32
    return %c0_i32, %c0_i32_0 : i32, i32
  }
  func.func @transform_6(%arg0: i32) -> (i32, i32) {
    %c0_i32 = arith.constant 0 : i32
    %c0_i32_0 = arith.constant 0 : i32
    %c0_i32_1 = arith.constant 0 : i32
    return %c0_i32, %c0_i32_0 : i32, i32
  }
  func.func @transform_7(%arg0: i32) -> (i32, i32) {
    %c0_i32 = arith.constant 0 : i32
    %c0_i32_0 = arith.constant 0 : i32
    %c0_i32_1 = arith.constant 0 : i32
    return %c0_i32, %c0_i32_0 : i32, i32
  }
  func.func @transform_8(%arg0: i32) -> (i32, i32) {
    %c0_i32 = arith.constant 0 : i32
    %c0_i32_0 = arith.constant 0 : i32
    %c0_i32_1 = arith.constant 0 : i32
    return %c0_i32, %c0_i32_0 : i32, i32
  }
  func.func @transform_9(%arg0: i32) -> (i32, i32) {
    %c0_i32 = arith.constant 0 : i32
    %c0_i32_0 = arith.constant 0 : i32
    %c0_i32_1 = arith.constant 0 : i32
    return %c0_i32, %c0_i32_0 : i32, i32
  }
  func.func @transform_10(%arg0: i32) -> (i32, i32, i32) {
    %c0_i32 = arith.constant 0 : i32
    %c0_i32_0 = arith.constant 0 : i32
    %c0_i32_1 = arith.constant 0 : i32
    return %arg0, %c0_i32, %c0_i32_0 : i32, i32, i32
  }
}

</mosaic_0001>

<bundles_post_ra>
// kernel: tpu_custom_call.1
= control target key start
LH: loop header
LB: loop body
LE: loop exit
PB: predicated region body
PF: predicated region fallthrough
CT: control target
= control target key end

     0   :  { %15 = vsyncpa [#allocation4], 0  ;;  %s1981_s0 = inlined_call_operand.vmem [shape: f32[2,8,32], index: 0, kind: input, shape index: {}]   ;;  %s1982_s1 = inlined_call_operand.vmem [shape: f32[2,6,32], index: 1, kind: input, shape index: {}]   ;;  %s1983_s2 = inlined_call_operand.vmem [shape: bf16[32,96], index: 2, kind: input, shape index: {}]   ;;  %s1984_s3 = inlined_call_operand.vmem [shape: f32[1,96], index: 3, kind: input, shape index: {}]   ;;  %s1985_s4 = inlined_call_operand.vmem [shape: bf16[32,32], index: 4, kind: input, shape index: {}]   ;;  %s1986_s5 = inlined_call_operand.vmem [shape: f32[1,32], index: 5, kind: input, shape index: {}]   ;;  %s1987_s6 = inlined_call_operand.vmem [shape: bf16[32,128], index: 6, kind: input, shape index: {}]   ;;  %s1988_s7 = inlined_call_operand.vmem [shape: f32[1,128], index: 7, kind: input, shape index: {}]   ;;  %s1989_s8 = inlined_call_operand.vmem [shape: bf16[128,32], index: 8, kind: input, shape index: {}]   ;;  %s1990_s9 = inlined_call_operand.vmem [shape: f32[1,32], index: 9, kind: input, shape index: {}]   ;;  %s1991_s10 = inlined_call_operand.hbm [shape: f32[2,8,32], index: 10, kind: output, shape index: {}]  }
   0x1   :  { %17 = vsyncpa [#allocation4 + $0x1], 0  ;;  %s1698_s13 = smov 0   ;;  %s1700_s14 = smov 0  }
   0x2   :  { %s1702_s15 = smov 0   ;;  %s1704_s16 = smov 0  }
   0x3 LB: > { %s1719_s17 = sadd.s32 4294967295, %s1624_s16   ;;  %s1305_s18 = sadd.s32 4294967294, %s1624_s16   ;;  %s1624_s16 = sphi %s1704_s16, %s1997_s16   ;;  %s1620_s15 = sphi %s1702_s15, %s1996_s15   ;;  %s1616_s14 = sphi %s1700_s14, %s1995_s14   ;;  %s1612_s13 = sphi %s1698_s13, %s1994_s13  }
   0x4   : > { %s1723_s19 = sadd.s32 1, %s1624_s16   ;;  %s250_s20 = sadd.s32 1, %s1620_s15 }
   0x5   : > { %s247_s21 = ssub.s32 %s1624_s16, %s1723_s19  ;;  %p260_p0 = scmp.ne.s32.totalorder %s1620_s15, %s1616_s14 }
   0x6   : > { %p248_p1 = scmp.eq.s32.totalorder %s247_s21, 0  ;;  %p261_p2 = scmp.eq.s32.totalorder %s1719_s17, 1 }
   0x7   : > { %p266_p3 = scmp.ne.s32.totalorder %s1616_s14, %s1612_s13  ;;  %p267_p4 = scmp.eq.s32.totalorder %s1305_s18, 1 }
   0x8   : > { %s1734_s22 = scalar_select %p248_p1, %s1620_s15, %s250_s20  }
   0x9   : > { %p1736_p5 = por %p261_p2, %p260_p0  ;;  %p1740_p6 = por %p267_p4, %p266_p3 }
   0xa   : > { %p1308_p7 = scmp.ge.s32.totalorder %s1624_s16, 1  ;;  %p323_p8 = scmp.lt.s32.totalorder %s1624_s16, 3 }
   0xc   : > { %p324_p9 = pnand %p1308_p7, %p323_p8 }
   0xd   : > { %p364_p10 = scmp.lt.s32.totalorder (!%p324_p9), %s1719_s17, 1  ;;  %vm375_vm0 = vcmask (!%p324_p9), 261120   ;;  %v1526_v7 = vld [vmem:[%s1983_s2] sm:$0xff] (!%p324_p9)   ;;  %v1626_v8 = vmov (!%p324_p9), 0.0   ;;  %vm1627_vm1 = vmmov (!%p324_p9), 0   ;;  %v1527_v9 = vld [vmem:[%s1983_s2 + $0x8] sm:$0xff] (!%p324_p9)   ;;  %v390_v12 = vlaneseq (!%p324_p9) }
   0xe   : > { %327 = sbr.rel (%p324_p9) target bundleno = 2612 (0xa34), region = 60  ;;  %1379 = vmatprep.subr.bf16.mxu0 (!%p324_p9), %v1626_v8  ;;  %1383 = vmatprep.mubr.msk.bf16.mxu0 (!%p324_p9), %vm1627_vm1, %v1626_v8  ;;  %v1312_v25 = vld [vmem:[%s1984_s3] ss:$0 sm:$0xff] (!%p324_p9)  ;;  %s1628_s28 = smov (!%p324_p9), 120   ;;  %vm471_vm2 = vcmask (!%p324_p9), 64512   ;;  %vm535_vm3 = vcmask (!%p324_p9), 1043456  }
   0xf   : > { %1380 = vmatpush3.bf16.msra.mxu0 (!%p324_p9), %v1526_v7  ;;  %1399 = vmatprep.subr.bf16.mxu1 (!%p324_p9), %v1626_v8  ;;  %v1776_v14 = vshrl.u32 (!%p324_p9), %v390_v12, 7  ;;  %s1630_s30 = smov (!%p324_p9), 88   ;;  %s1631_s11 = smov (!%p324_p9), 80   ;;  %vm694_vm4 = vcmask (!%p324_p9), 130112   ;;  %vm810_vm5 = vcmask (!%p324_p9), 195712   ;;  %vm926_vm6 = vcmask (!%p324_p9), 261312  }
  0x10   : > { %1381 = vmatprep.subr.bf16.mxu0 (!%p324_p9), %v1626_v8  ;;  %1401 = vmatprep.mubr.msk.bf16.mxu1 (!%p324_p9), %vm1627_vm1, %v1626_v8  ;;  %s1632_s12 = smov (!%p324_p9), 112   ;;  %s1633_s18 = smov (!%p324_p9), 72  }
  0x11   : > { %v392_v15 = vsub.s32 (!%p324_p9), 1, %v1776_v14  ;;  %v397_v17 = vsub.s32 (!%p324_p9), 0, %v1776_v14  ;;  %s1634_s20 = smov (!%p324_p9), 104   ;;  %s1635_s21 = smov (!%p324_p9), 64  }
  0x13   : > { %1382 = vmatpush3.bf16.msra.mxu0 (!%p324_p9), %v1527_v9 }
  0x14   : > { %1387 = vmatprep.subr.bf16.mxu0 (!%p324_p9), %v1626_v8 }
  0x15   : > { %s1748_s25 = scalar_select %p364_p10, %s1719_s17, 1 }
  0x17   : > { %s1310_s26 = sshll.u32 %s1748_s25, 3  ;;  %s1637_s25 = smov 48  }
  0x18   : > { %s367_s29 = scalar_lea.vmem %s1981_s0, %s1310_s26  ;;  %s371_s27 = scalar_lea.vmem %s1982_s1, %s1310_s26 }
  0x19   : > { %v1756_v0 = vld [vmem:[%s367_s29] sm:$0xff]  ;;  %s1629_s29 = smov 96   ;;  %s1638_s26 = smov 40  }
  0x1a   : > { %v376_v1 = vsel %vm375_vm0, %v1756_v0, 0.0  ;;  %v1784_v16 = vld [vmem:[%s371_s27] sm:$0x3f]  ;;  %s1636_s27 = smov 56  }
  0x1b   : > { %377 = vadd.xlane.f32.xlu0 %v376_v1  ;;  %v393_v18 = vrot.slane %v1784_v16, %v392_v15  ;;  %v398_v21 = vrot.slane %v1784_v16, %v397_v17 }
  0xa8   : > { %v378_v2 = vpop.xlane.xlu0 %377 }
  0xa9   : > { %v380_v3 = vmul.f32 0.03125, %v378_v2 }
  0xab   : > { %v381_v4 = vsub.f32 %v1756_v0, %v380_v3 }
  0xad   : > { %v382_v5 = vmul.f32 %v381_v4, %v381_v4 }
  0xaf   : > { %v383_v6 = vsel %vm375_vm0, %v382_v5, 0.0 }
  0xb0   : > { %384 = vadd.xlane.f32.xlu0 %v383_v6 }
 0x13d   : > { %v385_v10 = vpop.xlane.xlu0 %384 }
 0x13e   : > { %v386_v11 = vmul.f32 0.03125, %v385_v10 }
 0x140   : > { %v387_v13 = vadd.f32 1e-05, %v386_v11 }
 0x142   : > { %1540 = vrsqrt.f32 %v387_v13 }
 0x14c   : > { %v1541_v19 = vpop.eup %1540 }
 0x14d   : > { %v389_v20 = vmul.f32 %v1541_v19, %v381_v4 }
 0x14f   : > { %v394_v22 = vmul.f32 %v393_v18, %v389_v20 }
 0x151   : > { %v399_v23 = vadd.f32 %v398_v21, %v394_v22 }
 0x153   : > { %v400_v24 = vpack.c.bf16 %v399_v23, %v399_v23 }
 0x155   : > { %1384 = vmatmul.mubr.msk.bf16.vlgmr.msra.gmra.mrb[0].mxu0 %vm375_vm0, %v400_v24 }
 0x156   : > { %1389 = vmatprep.mubr.msk.bf16.mxu0 %vm1627_vm1, %v1626_v8 }
 0x228   : > { %v461_v26 = vpop.f32.mrb[0].mxu0 }
 0x229   : > { %v462_v27 = vadd.f32 %v1312_v25, %v461_v26  ;;  %v1385_v28 = vpop.f32.mrb[1].mxu0 }
 0x22a   : > { %v464_v29 = vpop.f32.mrb[2].mxu0 }
 0x22b   : > { %v1795_v30 = vpack.c.bf16 %v462_v27, %v462_v27  ;;  %v1386_v31 = vpop.f32.mrb[3].mxu0 }
 0x22d   : > { %580 = vrot.lane.b32.xlu0 %v1795_v30, %s1628_s28  ;;  %469 = vrot.lane.b32.xlu1 %v1795_v30, %s1629_s29  ;;  %s1639_s28 = smov 8  }
 0x231   : > { %582 = vrot.lane.b32.xlu1 %v1795_v30, %s1630_s30  ;;  %s1342_s30 = sshll.u32 %s1719_s17, 7 }
 0x235   : > { %698 = vrot.lane.b32.xlu1 %v1795_v30, %s1631_s11 }
 0x239   : > { %696 = vrot.lane.b32.xlu1 %v1795_v30, %s1632_s12 }
 0x23d   : > { %814 = vrot.lane.b32.xlu1 %v1795_v30, %s1633_s18  ;;  %s1640_s18 = smov 16  }
 0x241   : > { %812 = vrot.lane.b32.xlu1 %v1795_v30, %s1634_s20  ;;  %s1641_s20 = smov 24  }
 0x29f   : > { %v470_v32 = vpop.permute.xlu1 %469  ;;  %v581_v37 = vpop.permute.xlu0 %580 }
 0x2a0   : > { %v476_v33 = vsel %vm471_vm2, %v470_v32, 0 }
 0x2a1   : > { %1388 = vmatpush3.bf16.xpose.msra.mxu0 %v476_v33 }
 0x2a2   : > { %1393 = vmatprep.subr.bf16.mxu0 %v1626_v8 }
 0x2a3   : > { %v583_v34 = vpop.permute.xlu1 %582 }
 0x2a4   : > { %v588_v35 = vsel %vm471_vm2, %v583_v34, 0 }
 0x2a5   : > { %1400 = vmatpush3.bf16.xpose.msra.mxu1 %v588_v35 }
 0x2a6   : > { %1411 = vmatprep.subr.bf16.mxu1 %v1626_v8 }
 0x2a7   : > { %v699_v36 = vpop.permute.xlu1 %698 }
 0x2a8   : > { %1390 = vmatmul.mubr.msk.bf16.vlgmr.msra.gmra.mrb[4].mxu0 %vm471_vm2, %v1795_v30  ;;  %v704_v39 = vsel %vm471_vm2, %v699_v36, 0 }
 0x2a9   : > { %1395 = vmatprep.mubr.msk.bf16.mxu0 %vm1627_vm1, %v1626_v8 }
 0x2ab   : > { %v697_v38 = vpop.permute.xlu1 %696 }
 0x2ac   : > { %1402 = vmatmul.mubr.msk.bf16.vlgmr.msra.gmra.mrb[0].mxu1 %vm471_vm2, %v581_v37 }
 0x2ad   : > { %1412 = vmatpush3.bf16.xpose.msra.mxu1 %v704_v39  ;;  %1413 = vmatprep.mubr.msk.bf16.mxu1 %vm1627_vm1, %v1626_v8 }
 0x2ae   : > { %1423 = vmatprep.subr.bf16.mxu1 %v1626_v8 }
 0x2af   : > { %v815_v40 = vpop.permute.xlu1 %814 }
 0x2b0   : > { %v820_v41 = vsel %vm471_vm2, %v815_v40, 0 }
 0x2b3   : > { %v813_v42 = vpop.permute.xlu1 %812 }
 0x2b4   : > { %1414 = vmatmul.mubr.msk.bf16.vlgmr.msra.gmra.mrb[4].mxu1 %vm471_vm2, %v697_v38 }
 0x2b5   : > { %1424 = vmatpush3.bf16.xpose.msra.mxu1 %v820_v41  ;;  %1425 = vmatprep.mubr.msk.bf16.mxu1 %vm1627_vm1, %v1626_v8 }
 0x2b6   : > { %1435 = vmatprep.subr.bf16.mxu1 %v1626_v8 }
 0x2bc   : > { %1426 = vmatmul.mubr.msk.bf16.vlgmr.msra.gmra.mrb[8].mxu1 %vm471_vm2, %v813_v42 }
 0x2bd   : > { %1439 = vmatprep.mubr.msk.bf16.mxu1 %vm1627_vm1, %v1626_v8 }
 0x37b   : > { %v512_v43 = vpop.f32.mrb[4].mxu0 }
 0x37c   : > { %v1391_v44 = vpop.f32.mrb[5].mxu0  ;;  %v518_v45 = vsel %vm471_vm2, %v512_v43, -inf }
 0x37d   : > { %519 = vmax.xlane.f32.xlu1 %v518_v45  ;;  %v515_v46 = vpop.f32.mrb[6].mxu0 }
 0x37e   : > { %v1392_v47 = vpop.f32.mrb[7].mxu0 }
 0x37f   : > { %v624_v48 = vpop.f32.mrb[0].mxu1 }
 0x380   : > { %v1403_v49 = vpop.f32.mrb[1].mxu1  ;;  %v630_v50 = vsel %vm471_vm2, %v624_v48, -inf }
 0x381   : > { %631 = vmax.xlane.f32.xlu0 %v630_v50  ;;  %v627_v51 = vpop.f32.mrb[2].mxu1 }
 0x382   : > { %v1404_v52 = vpop.f32.mrb[3].mxu1 }
 0x387   : > { %v740_v53 = vpop.f32.mrb[4].mxu1 }
 0x388   : > { %v1415_v54 = vpop.f32.mrb[5].mxu1  ;;  %v746_v55 = vsel %vm471_vm2, %v740_v53, -inf }
 0x389   : > { %v743_v56 = vpop.f32.mrb[6].mxu1  ;;  %747 = vmax.xlane.f32.xlu1 %v746_v55  ;;  %v1528_v55 = vld [vmem:[%s1985_s4] sm:$0xff]  }
 0x38a   : > { %v1416_v57 = vpop.f32.mrb[7].mxu1  ;;  %1436 = vmatpush3.bf16.msra.mxu1 %v1528_v55  ;;  %v1529_v56 = vld [vmem:[%s1985_s4 + $0x8] sm:$0xff]  }
 0x38b   : > { %1437 = vmatprep.subr.bf16.mxu1 %v1626_v8 }
 0x38e   : > { %1438 = vmatpush3.bf16.msra.mxu1 %v1529_v56 }
 0x38f   : > { %v856_v58 = vpop.f32.mrb[8].mxu1  ;;  %1451 = vmatprep.subr.bf16.mxu1 %v1626_v8 }
 0x390   : > { %v1427_v59 = vpop.f32.mrb[9].mxu1  ;;  %v862_v60 = vsel %vm471_vm2, %v856_v58, -inf }
 0x391   : > { %863 = vmax.xlane.f32.xlu0 %v862_v60  ;;  %v859_v61 = vpop.f32.mrb[10].mxu1 }
 0x392   : > { %v1428_v62 = vpop.f32.mrb[11].mxu1 }
 0x40a   : > { %v520_v63 = vpop.xlane.xlu1 %519 }
 0x40b   : > { %v521_v1 = vsub.f32 %v512_v43, %v520_v63 }
 0x40d   : > { %v522_v2 = vmul.f32 1.442695, %v521_v1 }
 0x40e   : > { %v632_v3 = vpop.xlane.xlu0 %631 }
 0x40f   : > { %1542 = vpow2.f32 %v522_v2  ;;  %v633_v4 = vsub.f32 %v624_v48, %v632_v3 }
 0x411   : > { %v634_v5 = vmul.f32 1.442695, %v633_v4 }
 0x413   : > { %1544 = vpow2.f32 %v634_v5 }
 0x416   : > { %v748_v18 = vpop.xlane.xlu1 %747 }
 0x417   : > { %v749_v19 = vsub.f32 %v740_v53, %v748_v18 }
 0x419   : > { %v1543_v6 = vpop.eup %1542  ;;  %v750_v20 = vmul.f32 1.442695, %v749_v19 }
 0x41a   : > { %v524_v7 = vsel %vm471_vm2, %v1543_v6, 0.0 }
 0x41b   : > { %525 = vadd.xlane.f32.xlu1 %v524_v7  ;;  %v998_v7 = vsub.s32 2, %v1776_v14 }
 0x41d   : > { %v1545_v9 = vpop.eup %1544 }
 0x41e   : > { %v864_v10 = vpop.xlane.xlu0 %863  ;;  %v636_v11 = vsel %vm471_vm2, %v1545_v9, 0.0 }
 0x41f   : > { %v865_v12 = vsub.f32 %v856_v58, %v864_v10  ;;  %637 = vadd.xlane.f32.xlu0 %v636_v11  ;;  %v999_v10 = vrot.slane %v1784_v16, %v998_v7 }
 0x421   : > { %v866_v13 = vmul.f32 1.442695, %v865_v12 }
 0x423   : > { %1546 = vpow2.f32 %v866_v13 }
 0x424   : > { %1548 = vpow2.f32 %v750_v20 }
 0x42c   : > { %530 = vrot.lane.b32.xlu1 %v1795_v30, %s1635_s21  ;;  %s1938_s21 = scalar_lea.hbm %s1991_s10, %s1342_s30 }
 0x42d   : > { %v1547_v15 = vpop.eup %1546 }
 0x42e   : > { %v868_v17 = vsel %vm471_vm2, %v1547_v15, 0.0  ;;  %v1549_v21 = vpop.eup %1548 }
 0x42f   : > { %869 = vadd.xlane.f32.xlu0 %v868_v17  ;;  %v752_v22 = vsel %vm471_vm2, %v1549_v21, 0.0 }
 0x445   : > { %642 = vrot.lane.b32.xlu0 %v1795_v30, %s1636_s27 }
 0x450   : > { %753 = vadd.xlane.f32.xlu1 %v752_v22 }
 0x461   : > { %758 = vrot.lane.b32.xlu1 %v1795_v30, %s1637_s25  ;;  %s361_s25 = sand.u32 1, %s1616_s14  }
 0x462   : > { %s1221_s27 = scalar_lea.sflag [#allocation4], %s361_s25 }
 0x465   : > { %874 = vrot.lane.b32.xlu1 %v1795_v30, %s1638_s26  ;;  %s1309_s26 = sshll.u32 %s361_s25, 3 }
 0x466   : > { %s363_s11 = scalar_lea.vmem [#allocation3], %s1309_s26  ;;  %s1642_s26 = smov [#allocation3]  }
 0x467   : > { %s1234_s12 = sshll.u32 %s363_s11, 4  ;;  %s1940_s12 = int_to_ptr.vmem [resolvable:$true] %s1234_s12 }
 0x468   : > { %s1562_s17 = scalar_lea.vmem %s1940_s12, 128 }
 0x469   : > { %p1563_p11 = scmp.ne.s32.totalorder %s1940_s12, %s1562_s17 }
 0x46b   : > { %p1564_p12 = pnand %p1563_p11, %p1736_p5 }
 0x46d   : > { %p1565_p13 = pneg %p1564_p12 }
 0x4a8   : > { %v526_v23 = vpop.xlane.xlu1 %525 }
 0x4a9   : > { %1550 = vrcp.f32 %v526_v23 }
 0x4ac   : > { %v531_v24 = vpop.permute.xlu1 %530  ;;  %v638_v26 = vpop.xlane.xlu0 %637 }
 0x4ad   : > { %v537_v25 = vsel %vm535_vm3, %v531_v24, 0  ;;  %1552 = vrcp.f32 %v638_v26  ;;  %v1530_v26 = vld [vmem:[%s1987_s6] sm:$0xff]  }
 0x4ae   : > { %1394 = vmatpush3.bf16.msra.mxu0 %v537_v25 }
 0x4af   : > { %1405 = vmatprep.subr.bf16.mxu0 %v1626_v8 }
 0x4b3   : > { %v1551_v27 = vpop.eup %1550 }
 0x4b4   : > { %v528_v28 = vmul.f32 %v1551_v27, %v1543_v6  ;;  %v1532_v27 = vld [vmem:[%s1989_s8] sm:$0xff]  }
 0x4b6   : > { %v529_v29 = vpack.c.bf16 %v528_v28, %v528_v28 }
 0x4b7   : > { %v1553_v30 = vpop.eup %1552 }
 0x4b8   : > { %1396 = vmatmul.mubr.msk.bf16.vlgmr.msra.gmra.mrb[8].mxu0 %vm471_vm2, %v529_v29  ;;  %v640_v32 = vmul.f32 %v1553_v30, %v1545_v9  ;;  %v1324_v9 = vld [vmem:[%s1986_s5] ss:$0 sm:$0xff] }
 0x4b9   : > { %1407 = vmatprep.mubr.msk.bf16.mxu0 %vm1627_vm1, %v1626_v8 }
 0x4ba   : > { %v641_v35 = vpack.c.bf16 %v640_v32, %v640_v32  ;;  %v1022_v32 = vsub.s32 3, %v1776_v14 }
 0x4bc   : > { %v870_v31 = vpop.xlane.xlu0 %869 }
 0x4c0   : > { %v643_v33 = vpop.permute.xlu0 %642 }
 0x4c1   : > { %v648_v34 = vsel %vm535_vm3, %v643_v33, 0 }
 0x4c2   : > { %1406 = vmatpush3.bf16.msra.mxu0 %v648_v34 }
 0x4c3   : > { %1417 = vmatprep.subr.bf16.mxu0 %v1626_v8 }
 0x4c5   : > { %1408 = vmatmul.mubr.msk.bf16.vlgmr.msra.gmra.mrb[12].mxu0 %vm471_vm2, %v641_v35  ;;  %v1023_v35 = vrot.slane %v1784_v16, %v1022_v32 }
 0x4c6   : > { %1419 = vmatprep.mubr.msk.bf16.mxu0 %vm1627_vm1, %v1626_v8 }
 0x4dd   : > { %v754_v36 = vpop.xlane.xlu1 %753 }
 0x4de   : > { %1554 = vrcp.f32 %v754_v36 }
 0x4df   : > { %1556 = vrcp.f32 %v870_v31  ;;  %v1017_v31 = vsub.s32 4, %v1776_v14 }
 0x4e1   : > { %v759_v37 = vpop.permute.xlu1 %758  ;;  %v1018_v33 = vrot.slane %v1784_v16, %v1017_v31 }
 0x4e2   : > { %v764_v38 = vsel %vm535_vm3, %v759_v37, 0 }
 0x4e3   : > { %1418 = vmatpush3.bf16.msra.mxu0 %v764_v38 }
 0x4e4   : > { %1429 = vmatprep.subr.bf16.mxu0 %v1626_v8 }
 0x4e5   : > { %v875_v41 = vpop.permute.xlu1 %874 }
 0x4e6   : > { %v880_v44 = vsel %vm535_vm3, %v875_v41, 0  ;;  %v1534_v41 = vld [vmem:[%s1989_s8 + $0x10] sm:$0xff]  }
 0x4e8   : > { %v1555_v39 = vpop.eup %1554 }
 0x4e9   : > { %v756_v40 = vmul.f32 %v1555_v39, %v1549_v21  ;;  %v1557_v43 = vpop.eup %1556 }
 0x4ea   : > { %v872_v45 = vmul.f32 %v1557_v43, %v1547_v15  ;;  %v1536_v43 = vld [vmem:[%s1989_s8 + $0x20] sm:$0xff]  }
 0x4eb   : > { %v757_v42 = vpack.c.bf16 %v756_v40, %v756_v40  ;;  %v1533_v40 = vld [vmem:[%s1989_s8 + $0x8] sm:$0xff]  }
 0x4ec   : > { %v873_v46 = vpack.c.bf16 %v872_v45, %v872_v45  ;;  %v1538_v45 = vld [vmem:[%s1989_s8 + $0x30] sm:$0xff]  }
 0x4ed   : > { %1420 = vmatmul.mubr.msk.bf16.vlgmr.msra.gmra.mrb[16].mxu0 %vm471_vm2, %v757_v42  ;;  %v1535_v42 = vld [vmem:[%s1989_s8 + $0x18] sm:$0xff]  }
 0x4ee   : > { %1430 = vmatpush3.bf16.msra.mxu0 %v880_v44  ;;  %1431 = vmatprep.mubr.msk.bf16.mxu0 %vm1627_vm1, %v1626_v8  ;;  %v1537_v44 = vld [vmem:[%s1989_s8 + $0x28] sm:$0xff]  }
 0x4ef   : > { %1443 = vmatprep.subr.bf16.mxu0 %v1626_v8 }
 0x4f5   : > { %1432 = vmatmul.mubr.msk.bf16.vlgmr.msra.gmra.mrb[20].mxu0 %vm471_vm2, %v873_v46  ;;  %v1539_v46 = vld [vmem:[%s1989_s8 + $0x38] sm:$0xff]  }
 0x4f6   : > { %1447 = vmatprep.mubr.msk.bf16.mxu0 %vm1627_vm1, %v1626_v8  ;;  %1444 = vmatpush3.bf16.msra.mxu0 %v1530_v26 }
 0x4f7   : > { %1445 = vmatprep.subr.bf16.mxu0 %v1626_v8 }
 0x58b   : > { %v573_v47 = vpop.f32.mrb[8].mxu0 }
 0x58c   : > { %579 = vst.msk [vmem:[#allocation2] sm:$0xff] %vm471_vm2, %v573_v47  ;;  %v1397_v48 = vpop.f32.mrb[9].mxu0  ;;  %v1328_v47 = vld [vmem:[%s1988_s7] ss:$0 sm:$0xff] }
 0x58d   : > { %v576_v49 = vpop.f32.mrb[10].mxu0 }
 0x58e   : > { %v1398_v50 = vpop.f32.mrb[11].mxu0 }
 0x598   : > { %v684_v51 = vpop.f32.mrb[12].mxu0 }
 0x599   : > { %691 = vrot.lane.b32.xlu0 %v684_v51, %s1639_s28  ;;  %v1409_v52 = vpop.f32.mrb[13].mxu0  ;;  %s1566_s28 = sshll.u32 %s1642_s26, 4  ;;  %s1567_s28 = int_to_ptr.vmem [resolvable:$false] %s1566_s28 }
 0x59a   : > { %v687_v53 = vpop.f32.mrb[14].mxu0  ;;  %s1568_s29 = scalar_lea.vmem %s1567_s28, 256  ;;  %p1569_p0 = scmp.lt.s32.totalorder %s1940_s12, %s1567_s28 }
 0x59b   : > { %v1410_v54 = vpop.f32.mrb[15].mxu0  ;;  %p1570_p1 = scmp.lt.s32.totalorder %s1568_s29, %s1562_s17 }
 0x59d   : > { %p1571_p2 = por %p1570_p1, %p1569_p0 }
 0x59f   : > { %p1572_p3 = pnand %p1571_p2, %p1565_p13 }
 0x5c0   : > { %v800_v57 = vpop.f32.mrb[16].mxu0 }
 0x5c1   : > { %807 = vrot.lane.b32.xlu1 %v800_v57, %s1640_s18  ;;  %v1421_v58 = vpop.f32.mrb[17].mxu0 }
 0x5c2   : > { %v803_v59 = vpop.f32.mrb[18].mxu0 }
 0x5c3   : > { %v1422_v60 = vpop.f32.mrb[19].mxu0 }
 0x5c8   : > { %v916_v61 = vpop.f32.mrb[20].mxu0 }
 0x5c9   : > { %923 = vrot.lane.b32.xlu0 %v916_v61, %s1641_s20  ;;  %v1433_v62 = vpop.f32.mrb[21].mxu0 }
 0x5ca   : > { %v919_v63 = vpop.f32.mrb[22].mxu0  ;;  %v1215_v62 = vsub.s32 5, %v1776_v14 }
 0x5cb   : > { %v1434_v1 = vpop.f32.mrb[23].mxu0  ;;  %v1332_v63 = vld [vmem:[%s1990_s9] ss:$0 sm:$0xff] }
 0x5cc   : > { %v1216_v1 = vrot.slane %v1784_v16, %v1215_v62 }
 0x60b   : > { %v692_v2 = vpop.permute.xlu0 %691 }
 0x60c   : > { %695 = vst.msk [vmem:[#allocation2] sm:$0xff] %vm694_vm4, %v692_v2 }
 0x633   : > { %v808_v3 = vpop.permute.xlu1 %807 }
 0x634   : > { %811 = vst.msk [vmem:[#allocation2] sm:$0xff] %vm810_vm5, %v808_v3 }
 0x63b   : > { %v924_v4 = vpop.permute.xlu0 %923 }
 0x63c   : > { %927 = vst.msk [vmem:[#allocation2] sm:$0xff] %vm926_vm6, %v924_v4 }
 0x643   : > { %v928_v5 = vld [vmem:[#allocation2] sm:$0xff] }
 0x644   : > { %v929_v6 = vpack.c.bf16 %v928_v5, %v928_v5 }
 0x646   : > { %1440 = vmatmul.mubr.msk.bf16.vlgmr.msra.gmra.mrb[12].mxu1 %vm375_vm0, %v929_v6 }
 0x647   : > { %1467 = vmatprep.mubr.msk.bf16.mxu1 %vm1627_vm1, %v1626_v8  ;;  %1452 = vmatpush3.bf16.msra.mxu1 %v1532_v27 }
 0x648   : > { %1453 = vmatprep.subr.bf16.mxu1 %v1626_v8 }
 0x64b   : > { %1454 = vmatpush3.bf16.msra.mxu1 %v1533_v40 }
 0x64c   : > { %1455 = vmatprep.subr.bf16.mxu1 %v1626_v8 }
 0x64f   : > { %1456 = vmatpush3.bf16.msra.mxu1 %v1534_v41 }
 0x650   : > { %1457 = vmatprep.subr.bf16.mxu1 %v1626_v8 }
 0x653   : > { %1458 = vmatpush3.bf16.msra.mxu1 %v1535_v42 }
 0x654   : > { %1459 = vmatprep.subr.bf16.mxu1 %v1626_v8 }
 0x657   : > { %1460 = vmatpush3.bf16.msra.mxu1 %v1536_v43 }
 0x658   : > { %1461 = vmatprep.subr.bf16.mxu1 %v1626_v8 }
 0x65b   : > { %1462 = vmatpush3.bf16.msra.mxu1 %v1537_v44 }
 0x65c   : > { %1463 = vmatprep.subr.bf16.mxu1 %v1626_v8 }
 0x65f   : > { %1464 = vmatpush3.bf16.msra.mxu1 %v1538_v45 }
 0x660   : > { %1465 = vmatprep.subr.bf16.mxu1 %v1626_v8 }
 0x663   : > { %1466 = vmatpush3.bf16.msra.mxu1 %v1539_v46 }
 0x719   : > { %v990_v11 = vpop.f32.mrb[12].mxu1 }
 0x71a   : > { %v991_v12 = vadd.f32 %v1324_v9, %v990_v11  ;;  %v1441_v13 = vpop.f32.mrb[13].mxu1 }
 0x71b   : > { %v993_v15 = vpop.f32.mrb[14].mxu1 }
 0x71c   : > { %v1000_v17 = vmul.f32 %v999_v10, %v991_v12  ;;  %v1442_v18 = vpop.f32.mrb[15].mxu1 }
 0x71e   : > { %v1875_v19 = vadd.f32 %v1000_v17, %v1756_v0  ;;  %v1531_v0 = vld [vmem:[%s1987_s6 + $0x8] sm:$0xff]  }
 0x71f   : > { %1446 = vmatpush3.bf16.msra.mxu0 %v1531_v0 }
 0x720   : > { %v1002_v20 = vsel %vm375_vm0, %v1875_v19, 0.0 }
 0x721   : > { %1003 = vadd.xlane.f32.xlu1 %v1002_v20 }
 0x7ae   : > { %v1004_v21 = vpop.xlane.xlu1 %1003 }
 0x7af   : > { %v1005_v22 = vmul.f32 0.03125, %v1004_v21 }
 0x7b1   : > { %v1006_v23 = vsub.f32 %v1875_v19, %v1005_v22 }
 0x7b3   : > { %v1007_v24 = vmul.f32 %v1006_v23, %v1006_v23 }
 0x7b5   : > { %v1008_v25 = vsel %vm375_vm0, %v1007_v24, 0.0 }
 0x7b6   : > { %1009 = vadd.xlane.f32.xlu0 %v1008_v25 }
 0x843   : > { %v1010_v28 = vpop.xlane.xlu0 %1009 }
 0x844   : > { %v1011_v29 = vmul.f32 0.03125, %v1010_v28 }
 0x846   : > { %v1012_v30 = vadd.f32 1e-05, %v1011_v29 }
 0x848   : > { %1558 = vrsqrt.f32 %v1012_v30 }
 0x852   : > { %v1559_v34 = vpop.eup %1558 }
 0x853   : > { %v1014_v36 = vmul.f32 %v1559_v34, %v1006_v23 }
 0x855   : > { %v1019_v37 = vmul.f32 %v1018_v33, %v1014_v36 }
 0x857   : > { %v1024_v38 = vadd.f32 %v1023_v35, %v1019_v37 }
 0x859   : > { %v1025_v39 = vpack.c.bf16 %v1024_v38, %v1024_v38 }
 0x85b   : > { %1448 = vmatmul.mubr.msk.bf16.vlgmr.msra.gmra.mrb[24].mxu0 %vm375_vm0, %v1025_v39 }
 0x92e   : > { %v1086_v48 = vpop.f32.mrb[24].mxu0 }
 0x92f   : > { %v1087_v49 = vadd.f32 %v1328_v47, %v1086_v48  ;;  %v1449_v50 = vpop.f32.mrb[25].mxu0 }
 0x930   : > { %v1089_v51 = vpop.f32.mrb[26].mxu0 }
 0x931   : > { %v1093_v52 = vmul.f32 0.044715, %v1087_v49  ;;  %v1450_v53 = vpop.f32.mrb[27].mxu0  ;;  %v1092_v8 = vmul.f32 0.5, %v1087_v49 }
 0x933   : > { %v1094_v54 = vmul.f32 %v1093_v52, %v1087_v49 }
 0x935   : > { %v1095_v55 = vmul.f32 %v1094_v54, %v1087_v49 }
 0x937   : > { %v1096_v56 = vadd.f32 %v1095_v55, %v1087_v49 }
 0x939   : > { %v1097_v57 = vmul.f32 0.7978846, %v1096_v56 }
 0x93b   : > { %1560 = vtanh.f32 %v1097_v57 }
 0x945   : > { %v1561_v58 = vpop.eup %1560 }
 0x946   : > { %v1099_v59 = vadd.f32 1.0, %v1561_v58 }
 0x948   : > { %v1100_v60 = vmul.f32 %v1099_v59, %v1092_v8 }
 0x94a   : > { %v1101_v61 = vpack.c.bf16 %v1100_v60, %v1100_v60 }
 0x94c   : > { %1468 = vmatmul.mubr.bf16.vlgmr.msra.gmra.mrb[16].mxu1 %v1101_v61 }
 0xa1f   : > { %v1207_v2 = vpop.f32.mrb[16].mxu1 }
 0xa20   : > { %v1208_v3 = vadd.f32 %v1332_v63, %v1207_v2  ;;  %v1469_v4 = vpop.f32.mrb[17].mxu1 }
 0xa21   : > { %v1210_v5 = vpop.f32.mrb[18].mxu1 }
 0xa22   : > { %v1217_v6 = vmul.f32 %v1216_v1, %v1208_v3  ;;  %v1470_v7 = vpop.f32.mrb[19].mxu1 }
 0xa24   : > { %v1218_v9 = vadd.f32 %v1217_v6, %v1875_v19 }
 0xa26   : > { %1219 = vst.msk [vmem:[%s363_s11] sm:$0xff] %vm375_vm0, %v1218_v9 }
 0xa27   : > { %1575 = shalt.err (!%p1572_p3)
}
 0xa28   : > { %s1576_s25 = scalar_lea.hbm %s1938_s21, 128  ;;  %s1580_s18 = scalar_lea.hbm %s1991_s10, 256 }
 0xa29   : > { %p1577_p4 = scmp.ne.s32.totalorder %s1938_s21, %s1576_s25  ;;  %p1581_p9 = scmp.lt.u32.totalorder %s1938_s21, %s1991_s10 }
 0xa2a   : > { %p1582_p10 = scmp.lt.u32.totalorder %s1580_s18, %s1576_s25  ;;  %p1584_p12 = scmp.lt.u32.totalorder %s1576_s25, %s1938_s21 }
 0xa2b   : > { %p1578_p7 = pnand %p1577_p4, %p1736_p5 }
 0xa2c   : > { %p1583_p11 = por %p1582_p10, %p1581_p9 }
 0xa2d   : > { %p1579_p8 = pneg %p1578_p7 }
 0xa2e   : > { %p1585_p13 = por %p1584_p12, %p1583_p11 }
 0xa30   : > { %p1586_p0 = pnand %p1585_p13, %p1579_p8 }
 0xa32   : > { %1589 = shalt.err (!%p1586_p0)
}
 0xa33   : > { %1471 = dma.vmem_to_hbm [thread:$0]  (%p1736_p5), %s1940_s12, 128, %s1938_s21, %s1221_s27  }
 0xa34 PF: > { %p1477_p1 = scmp.ge.s32.totalorder %s1624_s16, 2  ;;  %s1246_s17 = sand.u32 1, %s1612_s13  }
 0xa35   : > { %s1247_s28 = scalar_lea.sflag [#allocation4], %s1246_s17 }
 0xa36   : > { %p1474_p2 = pnand %p1477_p1, %p1740_p6 }
 0xa38   : > { %1607 = dma.done.wait (!%p1474_p2), %s1247_s28, 128  }
 0xa39   : > { %1609 = vsyncadd (!%p1474_p2), %s1247_s28, 4294967168  ;;  %p20_p3 = scmp.ge.s32.totalorder %s1723_s19, 4   ;;  %s1994_s13 = smov %s1616_s14 }
 0xa3a   : > { %s1995_s14 = smov %s1620_s15  ;;  %s1996_s15 = smov %s1734_s22 }
 0xa3b   : > { %s1997_s16 = smov %s1723_s19  ;;  %22 = sbr.rel (!%p20_p3) target bundleno = 3 (0x3), region = 98 }
 0xa42   :  { %1252 = vsyncpa [#allocation4], 1 }
 0xa43   :  { %1254 = vsyncpa [#allocation4 + $0x1], 1 }

// kernel: tpu_custom_call.1
= control target key start
LH: loop header
LB: loop body
LE: loop exit
PB: predicated region body
PF: predicated region fallthrough
CT: control target
= control target key end

     0   :  { %15 = vsyncpa [#allocation4], 0  ;;  %s1981_s0 = inlined_call_operand.vmem [shape: f32[2,8,32], index: 0, kind: input, shape index: {}]   ;;  %s1982_s1 = inlined_call_operand.vmem [shape: f32[2,6,32], index: 1, kind: input, shape index: {}]   ;;  %s1983_s2 = inlined_call_operand.vmem [shape: bf16[32,96], index: 2, kind: input, shape index: {}]   ;;  %s1984_s3 = inlined_call_operand.vmem [shape: f32[1,96], index: 3, kind: input, shape index: {}]   ;;  %s1985_s4 = inlined_call_operand.vmem [shape: bf16[32,32], index: 4, kind: input, shape index: {}]   ;;  %s1986_s5 = inlined_call_operand.vmem [shape: f32[1,32], index: 5, kind: input, shape index: {}]   ;;  %s1987_s6 = inlined_call_operand.vmem [shape: bf16[32,128], index: 6, kind: input, shape index: {}]   ;;  %s1988_s7 = inlined_call_operand.vmem [shape: f32[1,128], index: 7, kind: input, shape index: {}]   ;;  %s1989_s8 = inlined_call_operand.vmem [shape: bf16[128,32], index: 8, kind: input, shape index: {}]   ;;  %s1990_s9 = inlined_call_operand.vmem [shape: f32[1,32], index: 9, kind: input, shape index: {}]   ;;  %s1991_s10 = inlined_call_operand.hbm [shape: f32[2,8,32], index: 10, kind: output, shape index: {}]  }
   0x1   :  { %17 = vsyncpa [#allocation4 + $0x1], 0  ;;  %s1698_s13 = smov 0   ;;  %s1700_s14 = smov 0  }
   0x2   :  { %s1702_s15 = smov 0   ;;  %s1704_s16 = smov 0  }
   0x3 LB: > { %s1719_s17 = sadd.s32 4294967295, %s1624_s16   ;;  %s1305_s18 = sadd.s32 4294967294, %s1624_s16   ;;  %s1624_s16 = sphi %s1704_s16, %s1997_s16   ;;  %s1620_s15 = sphi %s1702_s15, %s1996_s15   ;;  %s1616_s14 = sphi %s1700_s14, %s1995_s14   ;;  %s1612_s13 = sphi %s1698_s13, %s1994_s13  }
   0x4   : > { %s1723_s19 = sadd.s32 1, %s1624_s16   ;;  %s250_s20 = sadd.s32 1, %s1620_s15 }
   0x5   : > { %s247_s21 = ssub.s32 %s1624_s16, %s1723_s19  ;;  %p260_p0 = scmp.ne.s32.totalorder %s1620_s15, %s1616_s14 }
   0x6   : > { %p248_p1 = scmp.eq.s32.totalorder %s247_s21, 0  ;;  %p261_p2 = scmp.eq.s32.totalorder %s1719_s17, 1 }
   0x7   : > { %p266_p3 = scmp.ne.s32.totalorder %s1616_s14, %s1612_s13  ;;  %p267_p4 = scmp.eq.s32.totalorder %s1305_s18, 1 }
   0x8   : > { %s1734_s22 = scalar_select %p248_p1, %s1620_s15, %s250_s20  }
   0x9   : > { %p1736_p5 = por %p261_p2, %p260_p0  ;;  %p1740_p6 = por %p267_p4, %p266_p3 }
   0xa   : > { %p1308_p7 = scmp.ge.s32.totalorder %s1624_s16, 1  ;;  %p323_p8 = scmp.lt.s32.totalorder %s1624_s16, 3 }
   0xc   : > { %p324_p9 = pnand %p1308_p7, %p323_p8 }
   0xd   : > { %p364_p10 = scmp.lt.s32.totalorder (!%p324_p9), %s1719_s17, 1  ;;  %vm375_vm0 = vcmask (!%p324_p9), 261120   ;;  %v1526_v7 = vld [vmem:[%s1983_s2] sm:$0xff] (!%p324_p9)   ;;  %v1626_v8 = vmov (!%p324_p9), 0.0   ;;  %vm1627_vm1 = vmmov (!%p324_p9), 0   ;;  %v1527_v9 = vld [vmem:[%s1983_s2 + $0x8] sm:$0xff] (!%p324_p9)   ;;  %v390_v12 = vlaneseq (!%p324_p9) }
   0xe   : > { %327 = sbr.rel (%p324_p9) target bundleno = 2612 (0xa34), region = 60  ;;  %1379 = vmatprep.subr.bf16.mxu0 (!%p324_p9), %v1626_v8  ;;  %1383 = vmatprep.mubr.msk.bf16.mxu0 (!%p324_p9), %vm1627_vm1, %v1626_v8  ;;  %v1312_v25 = vld [vmem:[%s1984_s3] ss:$0 sm:$0xff] (!%p324_p9)  ;;  %s1628_s28 = smov (!%p324_p9), 120   ;;  %vm471_vm2 = vcmask (!%p324_p9), 64512   ;;  %vm535_vm3 = vcmask (!%p324_p9), 1043456  }
   0xf   : > { %1380 = vmatpush3.bf16.msra.mxu0 (!%p324_p9), %v1526_v7  ;;  %1399 = vmatprep.subr.bf16.mxu1 (!%p324_p9), %v1626_v8  ;;  %v1776_v14 = vshrl.u32 (!%p324_p9), %v390_v12, 7  ;;  %s1630_s30 = smov (!%p324_p9), 88   ;;  %s1631_s11 = smov (!%p324_p9), 80   ;;  %vm694_vm4 = vcmask (!%p324_p9), 130112   ;;  %vm810_vm5 = vcmask (!%p324_p9), 195712   ;;  %vm926_vm6 = vcmask (!%p324_p9), 261312  }
  0x10   : > { %1381 = vmatprep.subr.bf16.mxu0 (!%p324_p9), %v1626_v8  ;;  %1401 = vmatprep.mubr.msk.bf16.mxu1 (!%p324_p9), %vm1627_vm1, %v1626_v8  ;;  %s1632_s12 = smov (!%p324_p9), 112   ;;  %s1633_s18 = smov (!%p324_p9), 72  }
  0x11   : > { %v392_v15 = vsub.s32 (!%p324_p9), 1, %v1776_v14  ;;  %v397_v17 = vsub.s32 (!%p324_p9), 0, %v1776_v14  ;;  %s1634_s20 = smov (!%p324_p9), 104   ;;  %s1635_s21 = smov (!%p324_p9), 64  }
  0x13   : > { %1382 = vmatpush3.bf16.msra.mxu0 (!%p324_p9), %v1527_v9 }
  0x14   : > { %1387 = vmatprep.subr.bf16.mxu0 (!%p324_p9), %v1626_v8 }
  0x15   : > { %s1748_s25 = scalar_select %p364_p10, %s1719_s17, 1 }
  0x17   : > { %s1310_s26 = sshll.u32 %s1748_s25, 3  ;;  %s1637_s25 = smov 48  }
  0x18   : > { %s367_s29 = scalar_lea.vmem %s1981_s0, %s1310_s26  ;;  %s371_s27 = scalar_lea.vmem %s1982_s1, %s1310_s26 }
  0x19   : > { %v1756_v0 = vld [vmem:[%s367_s29] sm:$0xff]  ;;  %s1629_s29 = smov 96   ;;  %s1638_s26 = smov 40  }
  0x1a   : > { %v376_v1 = vsel %vm375_vm0, %v1756_v0, 0.0  ;;  %v1784_v16 = vld [vmem:[%s371_s27] sm:$0x3f]  ;;  %s1636_s27 = smov 56  }
  0x1b   : > { %377 = vadd.xlane.f32.xlu0 %v376_v1  ;;  %v393_v18 = vrot.slane %v1784_v16, %v392_v15  ;;  %v398_v21 = vrot.slane %v1784_v16, %v397_v17 }
  0xa8   : > { %v378_v2 = vpop.xlane.xlu0 %377 }
  0xa9   : > { %v380_v3 = vmul.f32 0.03125, %v378_v2 }
  0xab   : > { %v381_v4 = vsub.f32 %v1756_v0, %v380_v3 }
  0xad   : > { %v382_v5 = vmul.f32 %v381_v4, %v381_v4 }
  0xaf   : > { %v383_v6 = vsel %vm375_vm0, %v382_v5, 0.0 }
  0xb0   : > { %384 = vadd.xlane.f32.xlu0 %v383_v6 }
 0x13d   : > { %v385_v10 = vpop.xlane.xlu0 %384 }
 0x13e   : > { %v386_v11 = vmul.f32 0.03125, %v385_v10 }
 0x140   : > { %v387_v13 = vadd.f32 1e-05, %v386_v11 }
 0x142   : > { %1540 = vrsqrt.f32 %v387_v13 }
 0x14c   : > { %v1541_v19 = vpop.eup %1540 }
 0x14d   : > { %v389_v20 = vmul.f32 %v1541_v19, %v381_v4 }
 0x14f   : > { %v394_v22 = vmul.f32 %v393_v18, %v389_v20 }
 0x151   : > { %v399_v23 = vadd.f32 %v398_v21, %v394_v22 }
 0x153   : > { %v400_v24 = vpack.c.bf16 %v399_v23, %v399_v23 }
 0x155   : > { %1384 = vmatmul.mubr.msk.bf16.vlgmr.msra.gmra.mrb[0].mxu0 %vm375_vm0, %v400_v24 }
 0x156   : > { %1389 = vmatprep.mubr.msk.bf16.mxu0 %vm1627_vm1, %v1626_v8 }
 0x228   : > { %v461_v26 = vpop.f32.mrb[0].mxu0 }
 0x229   : > { %v462_v27 = vadd.f32 %v1312_v25, %v461_v26  ;;  %v1385_v28 = vpop.f32.mrb[1].mxu0 }
 0x22a   : > { %v464_v29 = vpop.f32.mrb[2].mxu0 }
 0x22b   : > { %v1795_v30 = vpack.c.bf16 %v462_v27, %v462_v27  ;;  %v1386_v31 = vpop.f32.mrb[3].mxu0 }
 0x22d   : > { %580 = vrot.lane.b32.xlu0 %v1795_v30, %s1628_s28  ;;  %469 = vrot.lane.b32.xlu1 %v1795_v30, %s1629_s29  ;;  %s1639_s28 = smov 8  }
 0x231   : > { %582 = vrot.lane.b32.xlu1 %v1795_v30, %s1630_s30  ;;  %s1342_s30 = sshll.u32 %s1719_s17, 7 }
 0x235   : > { %698 = vrot.lane.b32.xlu1 %v1795_v30, %s1631_s11 }
 0x239   : > { %696 = vrot.lane.b32.xlu1 %v1795_v30, %s1632_s12 }
 0x23d   : > { %814 = vrot.lane.b32.xlu1 %v1795_v30, %s1633_s18  ;;  %s1640_s18 = smov 16  }
 0x241   : > { %812 = vrot.lane.b32.xlu1 %v1795_v30, %s1634_s20  ;;  %s1641_s20 = smov 24  }
 0x29f   : > { %v470_v32 = vpop.permute.xlu1 %469  ;;  %v581_v37 = vpop.permute.xlu0 %580 }
 0x2a0   : > { %v476_v33 = vsel %vm471_vm2, %v470_v32, 0 }
 0x2a1   : > { %1388 = vmatpush3.bf16.xpose.msra.mxu0 %v476_v33 }
 0x2a2   : > { %1393 = vmatprep.subr.bf16.mxu0 %v1626_v8 }
 0x2a3   : > { %v583_v34 = vpop.permute.xlu1 %582 }
 0x2a4   : > { %v588_v35 = vsel %vm471_vm2, %v583_v34, 0 }
 0x2a5   : > { %1400 = vmatpush3.bf16.xpose.msra.mxu1 %v588_v35 }
 0x2a6   : > { %1411 = vmatprep.subr.bf16.mxu1 %v1626_v8 }
 0x2a7   : > { %v699_v36 = vpop.permute.xlu1 %698 }
 0x2a8   : > { %1390 = vmatmul.mubr.msk.bf16.vlgmr.msra.gmra.mrb[4].mxu0 %vm471_vm2, %v1795_v30  ;;  %v704_v39 = vsel %vm471_vm2, %v699_v36, 0 }
 0x2a9   : > { %1395 = vmatprep.mubr.msk.bf16.mxu0 %vm1627_vm1, %v1626_v8 }
 0x2ab   : > { %v697_v38 = vpop.permute.xlu1 %696 }
 0x2ac   : > { %1402 = vmatmul.mubr.msk.bf16.vlgmr.msra.gmra.mrb[0].mxu1 %vm471_vm2, %v581_v37 }
 0x2ad   : > { %1412 = vmatpush3.bf16.xpose.msra.mxu1 %v704_v39  ;;  %1413 = vmatprep.mubr.msk.bf16.mxu1 %vm1627_vm1, %v1626_v8 }
 0x2ae   : > { %1423 = vmatprep.subr.bf16.mxu1 %v1626_v8 }
 0x2af   : > { %v815_v40 = vpop.permute.xlu1 %814 }
 0x2b0   : > { %v820_v41 = vsel %vm471_vm2, %v815_v40, 0 }
 0x2b3   : > { %v813_v42 = vpop.permute.xlu1 %812 }
 0x2b4   : > { %1414 = vmatmul.mubr.msk.bf16.vlgmr.msra.gmra.mrb[4].mxu1 %vm471_vm2, %v697_v38 }
 0x2b5   : > { %1424 = vmatpush3.bf16.xpose.msra.mxu1 %v820_v41  ;;  %1425 = vmatprep.mubr.msk.bf16.mxu1 %vm1627_vm1, %v1626_v8 }
 0x2b6   : > { %1435 = vmatprep.subr.bf16.mxu1 %v1626_v8 }
 0x2bc   : > { %1426 = vmatmul.mubr.msk.bf16.vlgmr.msra.gmra.mrb[8].mxu1 %vm471_vm2, %v813_v42 }
 0x2bd   : > { %1439 = vmatprep.mubr.msk.bf16.mxu1 %vm1627_vm1, %v1626_v8 }
 0x37b   : > { %v512_v43 = vpop.f32.mrb[4].mxu0 }
 0x37c   : > { %v1391_v44 = vpop.f32.mrb[5].mxu0  ;;  %v518_v45 = vsel %vm471_vm2, %v512_v43, -inf }
 0x37d   : > { %519 = vmax.xlane.f32.xlu1 %v518_v45  ;;  %v515_v46 = vpop.f32.mrb[6].mxu0 }
 0x37e   : > { %v1392_v47 = vpop.f32.mrb[7].mxu0 }
 0x37f   : > { %v624_v48 = vpop.f32.mrb[0].mxu1 }
 0x380   : > { %v1403_v49 = vpop.f32.mrb[1].mxu1  ;;  %v630_v50 = vsel %vm471_vm2, %v624_v48, -inf }
 0x381   : > { %631 = vmax.xlane.f32.xlu0 %v630_v50  ;;  %v627_v51 = vpop.f32.mrb[2].mxu1 }
 0x382   : > { %v1404_v52 = vpop.f32.mrb[3].mxu1 }
 0x387   : > { %v740_v53 = vpop.f32.mrb[4].mxu1 }
 0x388   : > { %v1415_v54 = vpop.f32.mrb[5].mxu1  ;;  %v746_v55 = vsel %vm471_vm2, %v740_v53, -inf }
 0x389   : > { %v743_v56 = vpop.f32.mrb[6].mxu1  ;;  %747 = vmax.xlane.f32.xlu1 %v746_v55  ;;  %v1528_v55 = vld [vmem:[%s1985_s4] sm:$0xff]  }
 0x38a   : > { %v1416_v57 = vpop.f32.mrb[7].mxu1  ;;  %1436 = vmatpush3.bf16.msra.mxu1 %v1528_v55  ;;  %v1529_v56 = vld [vmem:[%s1985_s4 + $0x8] sm:$0xff]  }
 0x38b   : > { %1437 = vmatprep.subr.bf16.mxu1 %v1626_v8 }
 0x38e   : > { %1438 = vmatpush3.bf16.msra.mxu1 %v1529_v56 }
 0x38f   : > { %v856_v58 = vpop.f32.mrb[8].mxu1  ;;  %1451 = vmatprep.subr.bf16.mxu1 %v1626_v8 }
 0x390   : > { %v1427_v59 = vpop.f32.mrb[9].mxu1  ;;  %v862_v60 = vsel %vm471_vm2, %v856_v58, -inf }
 0x391   : > { %863 = vmax.xlane.f32.xlu0 %v862_v60  ;;  %v859_v61 = vpop.f32.mrb[10].mxu1 }
 0x392   : > { %v1428_v62 = vpop.f32.mrb[11].mxu1 }
 0x40a   : > { %v520_v63 = vpop.xlane.xlu1 %519 }
 0x40b   : > { %v521_v1 = vsub.f32 %v512_v43, %v520_v63 }
 0x40d   : > { %v522_v2 = vmul.f32 1.442695, %v521_v1 }
 0x40e   : > { %v632_v3 = vpop.xlane.xlu0 %631 }
 0x40f   : > { %1542 = vpow2.f32 %v522_v2  ;;  %v633_v4 = vsub.f32 %v624_v48, %v632_v3 }
 0x411   : > { %v634_v5 = vmul.f32 1.442695, %v633_v4 }
 0x413   : > { %1544 = vpow2.f32 %v634_v5 }
 0x416   : > { %v748_v18 = vpop.xlane.xlu1 %747 }
 0x417   : > { %v749_v19 = vsub.f32 %v740_v53, %v748_v18 }
 0x419   : > { %v1543_v6 = vpop.eup %1542  ;;  %v750_v20 = vmul.f32 1.442695, %v749_v19 }
 0x41a   : > { %v524_v7 = vsel %vm471_vm2, %v1543_v6, 0.0 }
 0x41b   : > { %525 = vadd.xlane.f32.xlu1 %v524_v7  ;;  %v998_v7 = vsub.s32 2, %v1776_v14 }
 0x41d   : > { %v1545_v9 = vpop.eup %1544 }
 0x41e   : > { %v864_v10 = vpop.xlane.xlu0 %863  ;;  %v636_v11 = vsel %vm471_vm2, %v1545_v9, 0.0 }
 0x41f   : > { %v865_v12 = vsub.f32 %v856_v58, %v864_v10  ;;  %637 = vadd.xlane.f32.xlu0 %v636_v11  ;;  %v999_v10 = vrot.slane %v1784_v16, %v998_v7 }
 0x421   : > { %v866_v13 = vmul.f32 1.442695, %v865_v12 }
 0x423   : > { %1546 = vpow2.f32 %v866_v13 }
 0x424   : > { %1548 = vpow2.f32 %v750_v20 }
 0x42c   : > { %530 = vrot.lane.b32.xlu1 %v1795_v30, %s1635_s21  ;;  %s1938_s21 = scalar_lea.hbm %s1991_s10, %s1342_s30 }
 0x42d   : > { %v1547_v15 = vpop.eup %1546 }
 0x42e   : > { %v868_v17 = vsel %vm471_vm2, %v1547_v15, 0.0  ;;  %v1549_v21 = vpop.eup %1548 }
 0x42f   : > { %869 = vadd.xlane.f32.xlu0 %v868_v17  ;;  %v752_v22 = vsel %vm471_vm2, %v1549_v21, 0.0 }
 0x445   : > { %642 = vrot.lane.b32.xlu0 %v1795_v30, %s1636_s27 }
 0x450   : > { %753 = vadd.xlane.f32.xlu1 %v752_v22 }
 0x461   : > { %758 = vrot.lane.b32.xlu1 %v1795_v30, %s1637_s25  ;;  %s361_s25 = sand.u32 1, %s1616_s14  }
 0x462   : > { %s1221_s27 = scalar_lea.sflag [#allocation4], %s361_s25 }
 0x465   : > { %874 = vrot.lane.b32.xlu1 %v1795_v30, %s1638_s26  ;;  %s1309_s26 = sshll.u32 %s361_s25, 3 }
 0x466   : > { %s363_s11 = scalar_lea.vmem [#allocation3], %s1309_s26  ;;  %s1642_s26 = smov [#allocation3]  }
 0x467   : > { %s1234_s12 = sshll.u32 %s363_s11, 4  ;;  %s1940_s12 = int_to_ptr.vmem [resolvable:$true] %s1234_s12 }
 0x468   : > { %s1562_s17 = scalar_lea.vmem %s1940_s12, 128 }
 0x469   : > { %p1563_p11 = scmp.ne.s32.totalorder %s1940_s12, %s1562_s17 }
 0x46b   : > { %p1564_p12 = pnand %p1563_p11, %p1736_p5 }
 0x46d   : > { %p1565_p13 = pneg %p1564_p12 }
 0x4a8   : > { %v526_v23 = vpop.xlane.xlu1 %525 }
 0x4a9   : > { %1550 = vrcp.f32 %v526_v23 }
 0x4ac   : > { %v531_v24 = vpop.permute.xlu1 %530  ;;  %v638_v26 = vpop.xlane.xlu0 %637 }
 0x4ad   : > { %v537_v25 = vsel %vm535_vm3, %v531_v24, 0  ;;  %1552 = vrcp.f32 %v638_v26  ;;  %v1530_v26 = vld [vmem:[%s1987_s6] sm:$0xff]  }
 0x4ae   : > { %1394 = vmatpush3.bf16.msra.mxu0 %v537_v25 }
 0x4af   : > { %1405 = vmatprep.subr.bf16.mxu0 %v1626_v8 }
 0x4b3   : > { %v1551_v27 = vpop.eup %1550 }
 0x4b4   : > { %v528_v28 = vmul.f32 %v1551_v27, %v1543_v6  ;;  %v1532_v27 = vld [vmem:[%s1989_s8] sm:$0xff]  }
 0x4b6   : > { %v529_v29 = vpack.c.bf16 %v528_v28, %v528_v28 }
 0x4b7   : > { %v1553_v30 = vpop.eup %1552 }
 0x4b8   : > { %1396 = vmatmul.mubr.msk.bf16.vlgmr.msra.gmra.mrb[8].mxu0 %vm471_vm2, %v529_v29  ;;  %v640_v32 = vmul.f32 %v1553_v30, %v1545_v9  ;;  %v1324_v9 = vld [vmem:[%s1986_s5] ss:$0 sm:$0xff] }
 0x4b9   : > { %1407 = vmatprep.mubr.msk.bf16.mxu0 %vm1627_vm1, %v1626_v8 }
 0x4ba   : > { %v641_v35 = vpack.c.bf16 %v640_v32, %v640_v32  ;;  %v1022_v32 = vsub.s32 3, %v1776_v14 }
 0x4bc   : > { %v870_v31 = vpop.xlane.xlu0 %869 }
 0x4c0   : > { %v643_v33 = vpop.permute.xlu0 %642 }
 0x4c1   : > { %v648_v34 = vsel %vm535_vm3, %v643_v33, 0 }
 0x4c2   : > { %1406 = vmatpush3.bf16.msra.mxu0 %v648_v34 }
 0x4c3   : > { %1417 = vmatprep.subr.bf16.mxu0 %v1626_v8 }
 0x4c5   : > { %1408 = vmatmul.mubr.msk.bf16.vlgmr.msra.gmra.mrb[12].mxu0 %vm471_vm2, %v641_v35  ;;  %v1023_v35 = vrot.slane %v1784_v16, %v1022_v32 }
 0x4c6   : > { %1419 = vmatprep.mubr.msk.bf16.mxu0 %vm1627_vm1, %v1626_v8 }
 0x4dd   : > { %v754_v36 = vpop.xlane.xlu1 %753 }
 0x4de   : > { %1554 = vrcp.f32 %v754_v36 }
 0x4df   : > { %1556 = vrcp.f32 %v870_v31  ;;  %v1017_v31 = vsub.s32 4, %v1776_v14 }
 0x4e1   : > { %v759_v37 = vpop.permute.xlu1 %758  ;;  %v1018_v33 = vrot.slane %v1784_v16, %v1017_v31 }
 0x4e2   : > { %v764_v38 = vsel %vm535_vm3, %v759_v37, 0 }
 0x4e3   : > { %1418 = vmatpush3.bf16.msra.mxu0 %v764_v38 }
 0x4e4   : > { %1429 = vmatprep.subr.bf16.mxu0 %v1626_v8 }
 0x4e5   : > { %v875_v41 = vpop.permute.xlu1 %874 }
 0x4e6   : > { %v880_v44 = vsel %vm535_vm3, %v875_v41, 0  ;;  %v1534_v41 = vld [vmem:[%s1989_s8 + $0x10] sm:$0xff]  }
 0x4e8   : > { %v1555_v39 = vpop.eup %1554 }
 0x4e9   : > { %v756_v40 = vmul.f32 %v1555_v39, %v1549_v21  ;;  %v1557_v43 = vpop.eup %1556 }
 0x4ea   : > { %v872_v45 = vmul.f32 %v1557_v43, %v1547_v15  ;;  %v1536_v43 = vld [vmem:[%s1989_s8 + $0x20] sm:$0xff]  }
 0x4eb   : > { %v757_v42 = vpack.c.bf16 %v756_v40, %v756_v40  ;;  %v1533_v40 = vld [vmem:[%s1989_s8 + $0x8] sm:$0xff]  }
 0x4ec   : > { %v873_v46 = vpack.c.bf16 %v872_v45, %v872_v45  ;;  %v1538_v45 = vld [vmem:[%s1989_s8 + $0x30] sm:$0xff]  }
 0x4ed   : > { %1420 = vmatmul.mubr.msk.bf16.vlgmr.msra.gmra.mrb[16].mxu0 %vm471_vm2, %v757_v42  ;;  %v1535_v42 = vld [vmem:[%s1989_s8 + $0x18] sm:$0xff]  }
 0x4ee   : > { %1430 = vmatpush3.bf16.msra.mxu0 %v880_v44  ;;  %1431 = vmatprep.mubr.msk.bf16.mxu0 %vm1627_vm1, %v1626_v8  ;;  %v1537_v44 = vld [vmem:[%s1989_s8 + $0x28] sm:$0xff]  }
 0x4ef   : > { %1443 = vmatprep.subr.bf16.mxu0 %v1626_v8 }
 0x4f5   : > { %1432 = vmatmul.mubr.msk.bf16.vlgmr.msra.gmra.mrb[20].mxu0 %vm471_vm2, %v873_v46  ;;  %v1539_v46 = vld [vmem:[%s1989_s8 + $0x38] sm:$0xff]  }
 0x4f6   : > { %1447 = vmatprep.mubr.msk.bf16.mxu0 %vm1627_vm1, %v1626_v8  ;;  %1444 = vmatpush3.bf16.msra.mxu0 %v1530_v26 }
 0x4f7   : > { %1445 = vmatprep.subr.bf16.mxu0 %v1626_v8 }
 0x58b   : > { %v573_v47 = vpop.f32.mrb[8].mxu0 }
 0x58c   : > { %579 = vst.msk [vmem:[#allocation2] sm:$0xff] %vm471_vm2, %v573_v47  ;;  %v1397_v48 = vpop.f32.mrb[9].mxu0  ;;  %v1328_v47 = vld [vmem:[%s1988_s7] ss:$0 sm:$0xff] }
 0x58d   : > { %v576_v49 = vpop.f32.mrb[10].mxu0 }
 0x58e   : > { %v1398_v50 = vpop.f32.mrb[11].mxu0 }
 0x598   : > { %v684_v51 = vpop.f32.mrb[12].mxu0 }
 0x599   : > { %691 = vrot.lane.b32.xlu0 %v684_v51, %s1639_s28  ;;  %v1409_v52 = vpop.f32.mrb[13].mxu0  ;;  %s1566_s28 = sshll.u32 %s1642_s26, 4  ;;  %s1567_s28 = int_to_ptr.vmem [resolvable:$false] %s1566_s28 }
 0x59a   : > { %v687_v53 = vpop.f32.mrb[14].mxu0  ;;  %s1568_s29 = scalar_lea.vmem %s1567_s28, 256  ;;  %p1569_p0 = scmp.lt.s32.totalorder %s1940_s12, %s1567_s28 }
 0x59b   : > { %v1410_v54 = vpop.f32.mrb[15].mxu0  ;;  %p1570_p1 = scmp.lt.s32.totalorder %s1568_s29, %s1562_s17 }
 0x59d   : > { %p1571_p2 = por %p1570_p1, %p1569_p0 }
 0x59f   : > { %p1572_p3 = pnand %p1571_p2, %p1565_p13 }
 0x5c0   : > { %v800_v57 = vpop.f32.mrb[16].mxu0 }
 0x5c1   : > { %807 = vrot.lane.b32.xlu1 %v800_v57, %s1640_s18  ;;  %v1421_v58 = vpop.f32.mrb[17].mxu0 }
 0x5c2   : > { %v803_v59 = vpop.f32.mrb[18].mxu0 }
 0x5c3   : > { %v1422_v60 = vpop.f32.mrb[19].mxu0 }
 0x5c8   : > { %v916_v61 = vpop.f32.mrb[20].mxu0 }
 0x5c9   : > { %923 = vrot.lane.b32.xlu0 %v916_v61, %s1641_s20  ;;  %v1433_v62 = vpop.f32.mrb[21].mxu0 }
 0x5ca   : > { %v919_v63 = vpop.f32.mrb[22].mxu0  ;;  %v1215_v62 = vsub.s32 5, %v1776_v14 }
 0x5cb   : > { %v1434_v1 = vpop.f32.mrb[23].mxu0  ;;  %v1332_v63 = vld [vmem:[%s1990_s9] ss:$0 sm:$0xff] }
 0x5cc   : > { %v1216_v1 = vrot.slane %v1784_v16, %v1215_v62 }
 0x60b   : > { %v692_v2 = vpop.permute.xlu0 %691 }
 0x60c   : > { %695 = vst.msk [vmem:[#allocation2] sm:$0xff] %vm694_vm4, %v692_v2 }
 0x633   : > { %v808_v3 = vpop.permute.xlu1 %807 }
 0x634   : > { %811 = vst.msk [vmem:[#allocation2] sm:$0xff] %vm810_vm5, %v808_v3 }
 0x63b   : > { %v924_v4 = vpop.permute.xlu0 %923 }
 0x63c   : > { %927 = vst.msk [vmem:[#allocation2] sm:$0xff] %vm926_vm6, %v924_v4 }
 0x643   : > { %v928_v5 = vld [vmem:[#allocation2] sm:$0xff] }
 0x644   : > { %v929_v6 = vpack.c.bf16 %v928_v5, %v928_v5 }
 0x646   : > { %1440 = vmatmul.mubr.msk.bf16.vlgmr.msra.gmra.mrb[12].mxu1 %vm375_vm0, %v929_v6 }
 0x647   : > { %1467 = vmatprep.mubr.msk.bf16.mxu1 %vm1627_vm1, %v1626_v8  ;;  %1452 = vmatpush3.bf16.msra.mxu1 %v1532_v27 }
 0x648   : > { %1453 = vmatprep.subr.bf16.mxu1 %v1626_v8 }
 0x64b   : > { %1454 = vmatpush3.bf16.msra.mxu1 %v1533_v40 }
 0x64c   : > { %1455 = vmatprep.subr.bf16.mxu1 %v1626_v8 }
 0x64f   : > { %1456 = vmatpush3.bf16.msra.mxu1 %v1534_v41 }
 0x650   : > { %1457 = vmatprep.subr.bf16.mxu1 %v1626_v8 }
 0x653   : > { %1458 = vmatpush3.bf16.msra.mxu1 %v1535_v42 }
 0x654   : > { %1459 = vmatprep.subr.bf16.mxu1 %v1626_v8 }
 0x657   : > { %1460 = vmatpush3.bf16.msra.mxu1 %v1536_v43 }
 0x658   : > { %1461 = vmatprep.subr.bf16.mxu1 %v1626_v8 }
 0x65b   : > { %1462 = vmatpush3.bf16.msra.mxu1 %v1537_v44 }
 0x65c   : > { %1463 = vmatprep.subr.bf16.mxu1 %v1626_v8 }
 0x65f   : > { %1464 = vmatpush3.bf16.msra.mxu1 %v1538_v45 }
 0x660   : > { %1465 = vmatprep.subr.bf16.mxu1 %v1626_v8 }
 0x663   : > { %1466 = vmatpush3.bf16.msra.mxu1 %v1539_v46 }
 0x719   : > { %v990_v11 = vpop.f32.mrb[12].mxu1 }
 0x71a   : > { %v991_v12 = vadd.f32 %v1324_v9, %v990_v11  ;;  %v1441_v13 = vpop.f32.mrb[13].mxu1 }
 0x71b   : > { %v993_v15 = vpop.f32.mrb[14].mxu1 }
 0x71c   : > { %v1000_v17 = vmul.f32 %v999_v10, %v991_v12  ;;  %v1442_v18 = vpop.f32.mrb[15].mxu1 }
 0x71e   : > { %v1875_v19 = vadd.f32 %v1000_v17, %v1756_v0  ;;  %v1531_v0 = vld [vmem:[%s1987_s6 + $0x8] sm:$0xff]  }
 0x71f   : > { %1446 = vmatpush3.bf16.msra.mxu0 %v1531_v0 }
 0x720   : > { %v1002_v20 = vsel %vm375_vm0, %v1875_v19, 0.0 }
 0x721   : > { %1003 = vadd.xlane.f32.xlu1 %v1002_v20 }
 0x7ae   : > { %v1004_v21 = vpop.xlane.xlu1 %1003 }
 0x7af   : > { %v1005_v22 = vmul.f32 0.03125, %v1004_v21 }
 0x7b1   : > { %v1006_v23 = vsub.f32 %v1875_v19, %v1005_v22 }
 0x7b3   : > { %v1007_v24 = vmul.f32 %v1006_v23, %v1006_v23 }
 0x7b5   : > { %v1008_v25 = vsel %vm375_vm0, %v1007_v24, 0.0 }
 0x7b6   : > { %1009 = vadd.xlane.f32.xlu0 %v1008_v25 }
 0x843   : > { %v1010_v28 = vpop.xlane.xlu0 %1009 }
 0x844   : > { %v1011_v29 = vmul.f32 0.03125, %v1010_v28 }
 0x846   : > { %v1012_v30 = vadd.f32 1e-05, %v1011_v29 }
 0x848   : > { %1558 = vrsqrt.f32 %v1012_v30 }
 0x852   : > { %v1559_v34 = vpop.eup %1558 }
 0x853   : > { %v1014_v36 = vmul.f32 %v1559_v34, %v1006_v23 }
 0x855   : > { %v1019_v37 = vmul.f32 %v1018_v33, %v1014_v36 }
 0x857   : > { %v1024_v38 = vadd.f32 %v1023_v35, %v1019_v37 }
 0x859   : > { %v1025_v39 = vpack.c.bf16 %v1024_v38, %v1024_v38 }
 0x85b   : > { %1448 = vmatmul.mubr.msk.bf16.vlgmr.msra.gmra.mrb[24].mxu0 %vm375_vm0, %v1025_v39 }
 0x92e   : > { %v1086_v48 = vpop.f32.mrb[24].mxu0 }
 0x92f   : > { %v1087_v49 = vadd.f32 %v1328_v47, %v1086_v48  ;;  %v1449_v50 = vpop.f32.mrb[25].mxu0 }
 0x930   : > { %v1089_v51 = vpop.f32.mrb[26].mxu0 }
 0x931   : > { %v1093_v52 = vmul.f32 0.044715, %v1087_v49  ;;  %v1450_v53 = vpop.f32.mrb[27].mxu0  ;;  %v1092_v8 = vmul.f32 0.5, %v1087_v49 }
 0x933   : > { %v1094_v54 = vmul.f32 %v1093_v52, %v1087_v49 }
 0x935   : > { %v1095_v55 = vmul.f32 %v1094_v54, %v1087_v49 }
 0x937   : > { %v1096_v56 = vadd.f32 %v1095_v55, %v1087_v49 }
 0x939   : > { %v1097_v57 = vmul.f32 0.7978846, %v1096_v56 }
 0x93b   : > { %1560 = vtanh.f32 %v1097_v57 }
 0x945   : > { %v1561_v58 = vpop.eup %1560 }
 0x946   : > { %v1099_v59 = vadd.f32 1.0, %v1561_v58 }
 0x948   : > { %v1100_v60 = vmul.f32 %v1099_v59, %v1092_v8 }
 0x94a   : > { %v1101_v61 = vpack.c.bf16 %v1100_v60, %v1100_v60 }
 0x94c   : > { %1468 = vmatmul.mubr.bf16.vlgmr.msra.gmra.mrb[16].mxu1 %v1101_v61 }
 0xa1f   : > { %v1207_v2 = vpop.f32.mrb[16].mxu1 }
 0xa20   : > { %v1208_v3 = vadd.f32 %v1332_v63, %v1207_v2  ;;  %v1469_v4 = vpop.f32.mrb[17].mxu1 }
 0xa21   : > { %v1210_v5 = vpop.f32.mrb[18].mxu1 }
 0xa22   : > { %v1217_v6 = vmul.f32 %v1216_v1, %v1208_v3  ;;  %v1470_v7 = vpop.f32.mrb[19].mxu1 }
 0xa24   : > { %v1218_v9 = vadd.f32 %v1217_v6, %v1875_v19 }
 0xa26   : > { %1219 = vst.msk [vmem:[%s363_s11] sm:$0xff] %vm375_vm0, %v1218_v9 }
 0xa27   : > { %1575 = shalt.err (!%p1572_p3)
}
 0xa28   : > { %s1576_s25 = scalar_lea.hbm %s1938_s21, 128  ;;  %s1580_s18 = scalar_lea.hbm %s1991_s10, 256 }
 0xa29   : > { %p1577_p4 = scmp.ne.s32.totalorder %s1938_s21, %s1576_s25  ;;  %p1581_p9 = scmp.lt.u32.totalorder %s1938_s21, %s1991_s10 }
 0xa2a   : > { %p1582_p10 = scmp.lt.u32.totalorder %s1580_s18, %s1576_s25  ;;  %p1584_p12 = scmp.lt.u32.totalorder %s1576_s25, %s1938_s21 }
 0xa2b   : > { %p1578_p7 = pnand %p1577_p4, %p1736_p5 }
 0xa2c   : > { %p1583_p11 = por %p1582_p10, %p1581_p9 }
 0xa2d   : > { %p1579_p8 = pneg %p1578_p7 }
 0xa2e   : > { %p1585_p13 = por %p1584_p12, %p1583_p11 }
 0xa30   : > { %p1586_p0 = pnand %p1585_p13, %p1579_p8 }
 0xa32   : > { %1589 = shalt.err (!%p1586_p0)
}
 0xa33   : > { %1471 = dma.vmem_to_hbm [thread:$0]  (%p1736_p5), %s1940_s12, 128, %s1938_s21, %s1221_s27  }
 0xa34 PF: > { %p1477_p1 = scmp.ge.s32.totalorder %s1624_s16, 2  ;;  %s1246_s17 = sand.u32 1, %s1612_s13  }
 0xa35   : > { %s1247_s28 = scalar_lea.sflag [#allocation4], %s1246_s17 }
 0xa36   : > { %p1474_p2 = pnand %p1477_p1, %p1740_p6 }
 0xa38   : > { %1607 = dma.done.wait (!%p1474_p2), %s1247_s28, 128  }
 0xa39   : > { %1609 = vsyncadd (!%p1474_p2), %s1247_s28, 4294967168  ;;  %p20_p3 = scmp.ge.s32.totalorder %s1723_s19, 4   ;;  %s1994_s13 = smov %s1616_s14 }
 0xa3a   : > { %s1995_s14 = smov %s1620_s15  ;;  %s1996_s15 = smov %s1734_s22 }
 0xa3b   : > { %s1997_s16 = smov %s1723_s19  ;;  %22 = sbr.rel (!%p20_p3) target bundleno = 3 (0x3), region = 98 }
 0xa42   :  { %1252 = vsyncpa [#allocation4], 1 }
 0xa43   :  { %1254 = vsyncpa [#allocation4 + $0x1], 1 }

</bundles_post_ra>
